<compile_context>
chip_gen: v5e
topology: v5e:2x2
jax: 0.10.0
libtpu: 0.0.40
codegen_flags: <defaults>
</compile_context>

<pallas_src>
import functools

import jax
import jax.numpy as jnp
import numpy as np
from jax.experimental import pallas as pl
from jax.experimental.pallas import tpu as pltpu


def _round_up(x, m):
    return ((x + m - 1) // m) * m


def _vmem_limit_bytes(tm, tn, K, x_bytes, w_bytes, o_bytes):
    # Double-buffered x / weight / bias / out tiles, 4x headroom, clamped to
    # [32 MiB, 64 MiB] (64 MiB == v7x physical VMEM; v5e/v6e have 128 MiB).
    per_step = tm * K * x_bytes + K * tn * w_bytes + tn * 4 + tm * tn * o_bytes
    need = 2 * per_step
    return int(min(max(4 * need, 32 * 1024 * 1024), 64 * 1024 * 1024))


def _linear_act_kernel(x_ref, w_ref, b_ref, o_ref, *, w0, apply_sine, compute_dtype):
    # MXU matmul with narrow (bf16) inputs, f32 accumulation.
    acc = jnp.dot(x_ref[...].astype(compute_dtype), w_ref[...],
                  preferred_element_type=jnp.float32)
    acc = acc + b_ref[...]                      # f32 bias row, broadcast over rows
    if apply_sine:
        acc = jnp.sin(w0 * acc)                 # f32 epilogue
    o_ref[...] = acc.astype(o_ref.dtype)


def fused_linear(x, w_kn, b_row, *, w0, apply_sine, out_dtype,
                 tm_max=256, tn_max=512):
    """y = act(w0 * (x @ w_kn + b)).  x: (M, K); w_kn: (K, N), N % 128 == 0."""
    M, K = x.shape
    Kw, N = w_kn.shape
    assert K == Kw, (K, Kw)
    assert N % 128 == 0, N
    assert tm_max % 8 == 0 and tn_max % 128 == 0

    # ---- M tiling: big tiles; keep >= 2 M-steps when possible (v7x: 2 TCs). ----
    Mp8 = _round_up(M, 8)
    tm = min(tm_max, Mp8)
    if 8 < Mp8 <= tm_max:
        tm = _round_up(pl.cdiv(Mp8, 2), 8)
    Mp = _round_up(M, tm)
    if Mp != M:
        x = jnp.pad(x, ((0, Mp - M), (0, 0)))   # padded rows are discarded later

    # ---- N tiling: lane-dense (multiple of 128) tile that divides N. ----
    if N <= tn_max:
        tn = N
    else:
        tn = 128
        for cand in range(tn_max, 127, -128):
            if N % cand == 0:
                tn = cand
                break

    grid = (pl.cdiv(Mp, tm), pl.cdiv(N, tn))
    kernel = functools.partial(_linear_act_kernel, w0=float(w0),
                               apply_sine=apply_sine, compute_dtype=w_kn.dtype)
    return pl.pallas_call(
        kernel,
        out_shape=jax.ShapeDtypeStruct((Mp, N), out_dtype),
        grid_spec=pltpu.PrefetchScalarGridSpec(
            num_scalar_prefetch=0,
            grid=grid,
            in_specs=[
                pl.BlockSpec((tm, K), lambda i, j: (i, 0)),   # activation tile
                pl.BlockSpec((K, tn), lambda i, j: (0, j)),   # weight column tile
                pl.BlockSpec((1, tn), lambda i, j: (0, j)),   # bias row tile
            ],
            out_specs=pl.BlockSpec((tm, tn), lambda i, j: (i, j)),
        ),
        compiler_params=pltpu.CompilerParams(
            dimension_semantics=("parallel", "parallel"),
            vmem_limit_bytes=_vmem_limit_bytes(
                tm, tn, K, x.dtype.itemsize, w_kn.dtype.itemsize,
                jnp.dtype(out_dtype).itemsize),
        ),
    )(x, w_kn, b_row)


def init_siren_params(key, D, W, input_ch, output_ch, w0=30.0):
    """PyTorch-layout (out_features, in_features) weights matching Siren.init_weights."""
    keys = jax.random.split(key, 2 * (D + 1))
    params = []
    b0 = 1.0 / input_ch
    params.append((
        jax.random.uniform(keys[0], (W, input_ch), jnp.float32, -b0, b0),
        jax.random.uniform(keys[1], (W,), jnp.float32, -b0, b0),
    ))
    bh = float(np.sqrt(6.0 / W) / w0)
    for i in range(1, D):
        params.append((
            jax.random.uniform(keys[2 * i], (W, W), jnp.float32, -bh, bh),
            jax.random.uniform(keys[2 * i + 1], (W,), jnp.float32, -bh, bh),
        ))
    params.append((
        jax.random.uniform(keys[2 * D], (output_ch, W), jnp.float32, -bh, bh),
        jax.random.uniform(keys[2 * D + 1], (output_ch,), jnp.float32, -bh, bh),
    ))
    return params


def prepare_params(params, input_ch, matmul_dtype=jnp.bfloat16):
    """One-time prep: transpose to (K, N), zero-pad to lane-dense widths, cast to bf16."""
    prepped, k_pad = [], input_ch
    for (w, b) in params:
        N, K = w.shape
        Np = _round_up(N, 128)
        w_kn = jnp.zeros((k_pad, Np), jnp.float32).at[:K, :N].set(
            jnp.asarray(w, jnp.float32).T)
        b_row = jnp.zeros((1, Np), jnp.float32).at[0, :N].set(
            jnp.asarray(b, jnp.float32))
        prepped.append((w_kn.astype(matmul_dtype), b_row, N))
        k_pad = Np            # next layer consumes the padded activation width
    return prepped


def transformer_modulated_siren_forward(x, prepped, *, w0=30.0,
                                        tm_max=256, tn_max=512):
    """Pallas equivalent of TransformerModulatedSiren.forward(x, vars=None)."""
    # TODO(synk): modulated_forward / transformer_forward / MTF_forward (embedder
    # positional encoding, FiLM modulations, input/output transformer MLPs) are
    # separate entry points not exercised by forward() and are not implemented here.
    lead, in_ch = x.shape[:-1], x.shape[-1]
    h = x.reshape(-1, in_ch).astype(jnp.float32)
    M = h.shape[0]
    n_layers = len(prepped)
    for li, (w_kn, b_row, _) in enumerate(prepped):
        is_last = li == n_layers - 1
        h = fused_linear(
            h, w_kn, b_row, w0=w0, apply_sine=not is_last,
            out_dtype=jnp.float32 if is_last else w_kn.dtype,
            tm_max=tm_max, tn_max=tn_max)
    out_ch = prepped[-1][2]
    return h[:M, :out_ch].reshape(lead + (out_ch,))


def reference_forward(x, prepped, *, w0=30.0):
    """Pure-JAX reference mirroring the kernel numerics (bf16 matmul, f32 epilogue)."""
    lead = x.shape[:-1]
    h = x.reshape(-1, x.shape[-1]).astype(jnp.float32)
    n_layers = len(prepped)
    for li, (w_kn, b_row, _) in enumerate(prepped):
        acc = jnp.dot(h.astype(w_kn.dtype), w_kn,
                      preferred_element_type=jnp.float32) + b_row
        if li < n_layers - 1:
            h = jnp.sin(w0 * acc).astype(w_kn.dtype)
        else:
            h = acc
    out_ch = prepped[-1][2]
    return h[:, :out_ch].reshape(lead + (out_ch,))


if __name__ == "__main__":
    key = jax.random.PRNGKey(0)
    k_x, k_p = jax.random.split(key)

    # Small TransformerModulatedSiren config: D sine layers of width W plus a
    # linear output head (the forward() path; skips=[], Sine activation w0=30).
    D, W, input_ch, output_ch, w0 = 4, 64, 4, 3, 30.0
    batch, height, width = 2, 8, 8                 # x: (batch, *, input_ch)

    x = jax.random.uniform(k_x, (batch, height, width, input_ch), jnp.float32,
                           minval=-1.0, maxval=1.0)
    params = init_siren_params(k_p, D, W, input_ch, output_ch, w0)
    prepped = prepare_params(params, input_ch, matmul_dtype=jnp.bfloat16)

    out = transformer_modulated_siren_forward(x, prepped, w0=w0)
    out = jax.block_until_ready(out)
    assert out.shape == (batch, height, width, output_ch), out.shape

    ref = jax.block_until_ready(reference_forward(x, prepped, w0=w0))
    np.testing.assert_allclose(np.asarray(out, np.float32),
                               np.asarray(ref, np.float32),
                               rtol=2e-2, atol=2e-2)

    print("KERNEL_OK")
</pallas_src>

<mosaic_0001>
module attributes {stable_mosaic.version = 11 : i64} {
  func.func @_linear_act_kernel(%arg0: i32, %arg1: i32, %arg2: memref<64x4xf32, #tpu.memory_space<vmem>>, %arg3: memref<4x128xbf16, #tpu.memory_space<vmem>>, %arg4: memref<1x128xf32, #tpu.memory_space<vmem>>, %arg5: memref<64x128xbf16, #tpu.memory_space<vmem>>) attributes {dimension_semantics = [#tpu.dimension_semantics<parallel>, #tpu.dimension_semantics<parallel>], iteration_bounds = array<i64: 2, 1>, scalar_prefetch = 0 : i64, scratch_operands = 0 : i64, tpu.core_type = #tpu.core_type<tc>, window_params = [{transform_indices = @transform_0, window_bounds = array<i64: 64, 4>}, {transform_indices = @transform_1, window_bounds = array<i64: 4, 128>}, {transform_indices = @transform_2, window_bounds = array<i64: 1, 128>}, {transform_indices = @transform_3, window_bounds = array<i64: 64, 128>}]} {
    %c0 = arith.constant 0 : index
    %c0_0 = arith.constant 0 : index
    %0 = vector.load %arg2[%c0, %c0_0] : memref<64x4xf32, #tpu.memory_space<vmem>>, vector<64x4xf32>
    %1 = arith.truncf %0 : vector<64x4xf32> to vector<64x4xbf16>
    %c0_1 = arith.constant 0 : index
    %c0_2 = arith.constant 0 : index
    %2 = vector.load %arg3[%c0_1, %c0_2] : memref<4x128xbf16, #tpu.memory_space<vmem>>, vector<4x128xbf16>
    %cst = arith.constant dense<0.000000e+00> : vector<64x128xf32>
    %3 = tpu.matmul %1, %2, %cst {dimension_numbers = #tpu.dot_dimension_numbers<[1], [0], [0], [1], [0, 0, 1, 1], [], []>} : vector<64x4xbf16>, vector<4x128xbf16>, vector<64x128xf32> -> vector<64x128xf32>
    %c0_3 = arith.constant 0 : index
    %c0_4 = arith.constant 0 : index
    %4 = vector.load %arg4[%c0_3, %c0_4] : memref<1x128xf32, #tpu.memory_space<vmem>>, vector<1x128xf32>
    %5 = vector.broadcast %4 : vector<1x128xf32> to vector<64x128xf32>
    %6 = arith.addf %3, %5 : vector<64x128xf32>
    %cst_5 = arith.constant 3.000000e+01 : f32
    %7 = vector.broadcast %cst_5 : f32 to vector<64x128xf32>
    %8 = arith.mulf %7, %6 : vector<64x128xf32>
    %9 = math.sin %8 : vector<64x128xf32>
    %10 = arith.truncf %9 : vector<64x128xf32> to vector<64x128xbf16>
    %c0_6 = arith.constant 0 : index
    %c0_7 = arith.constant 0 : index
    %11 = vector.load %arg5[%c0_6, %c0_7] : memref<64x128xbf16, #tpu.memory_space<vmem>>, vector<64x128xbf16>
    tpu.vector_store %arg5[%c0_6, %c0_7], %10 {strides = array<i32>} : memref<64x128xbf16, #tpu.memory_space<vmem>>, vector<64x128xbf16>,
    return
  }
  func.func @transform_0(%arg0: i32, %arg1: i32) -> (i32, i32) {
    %c0_i32 = arith.constant 0 : i32
    %c0_i32_0 = arith.constant 0 : i32
    return %arg0, %c0_i32 : i32, i32
  }
  func.func @transform_1(%arg0: i32, %arg1: i32) -> (i32, i32) {
    %c0_i32 = arith.constant 0 : i32
    %c0_i32_0 = arith.constant 0 : i32
    return %c0_i32, %arg1 : i32, i32
  }
  func.func @transform_2(%arg0: i32, %arg1: i32) -> (i32, i32) {
    %c0_i32 = arith.constant 0 : i32
    %c0_i32_0 = arith.constant 0 : i32
    return %c0_i32, %arg1 : i32, i32
  }
  func.func @transform_3(%arg0: i32, %arg1: i32) -> (i32, i32) {
    %c0_i32 = arith.constant 0 : i32
    return %arg0, %arg1 : i32, i32
  }
}

</mosaic_0001>

<bundles_post_ra>
// kernel: tpu_custom_call.1
= control target key start
LH: loop header
LB: loop body
LE: loop exit
PB: predicated region body
PF: predicated region fallthrough
CT: control target
= control target key end

     0   :  { %8 = vsyncpa [#allocation3], 0  ;;  %s3251_s0 = inlined_call_operand.vmem [shape: f32[128,4], index: 0, kind: input, shape index: {}]   ;;  %s3252_s1 = inlined_call_operand.vmem [shape: bf16[4,128], index: 1, kind: input, shape index: {}]   ;;  %s3253_s2 = inlined_call_operand.vmem [shape: f32[1,128], index: 2, kind: input, shape index: {}]   ;;  %s3254_s3 = inlined_call_operand.hbm [shape: bf16[128,128], index: 3, kind: output, shape index: {}]  }
   0x1   :  { %10 = vsyncpa [#allocation3 + $0x1], 0  ;;  %s1906_s12 = smov 0   ;;  %s1908_s13 = smov 0  }
   0x2   :  { %s1910_s14 = smov 0   ;;  %s1912_s15 = smov 0  }
   0x3   :  { %s1914_s16 = smov 0   ;;  %s1916_s17 = smov 0  }
   0x4 LB: > { %s1661_s18 = sadd.s32 4294967295, %s1875_s17   ;;  %s1662_s19 = sadd.s32 4294967294, %s1875_s17   ;;  %s1875_s17 = sphi %s1916_s17, %s16_s17   ;;  %s1871_s16 = sphi %s1914_s16, %s3350_s16   ;;  %s1867_s15 = sphi %s1912_s15, %s3349_s15   ;;  %s1863_s14 = sphi %s1910_s14, %s3348_s14   ;;  %s1859_s13 = sphi %s1908_s13, %s3347_s13   ;;  %s1855_s12 = sphi %s1906_s12, %s3346_s12  }
   0x5   : > { %s28_s20 = sadd.s32 1, %s1871_s16  ;;  %s115_s21 = sadd.s32 1, %s1863_s14 }
   0x6   : > { %p30_p0 = scmp.ge.s32.totalorder %s28_s20, 2  ;;  %p125_p1 = scmp.ne.s32.totalorder %s1863_s14, %s1859_s13 }
   0x7   : > { %p126_p2 = scmp.eq.s32.totalorder %s1661_s18, 1  ;;  %p131_p3 = scmp.ne.s32.totalorder %s1859_s13, %s1855_s12 }
   0x8   : > { %s3352_s20 = smov (%p30_p0, %s28_s20), 0  ;;  %p132_p5 = scmp.eq.s32.totalorder %s1662_s19, 1 }
   0x9   : > { %p1946_p4 = por %p126_p2, %p125_p1  ;;  %s110_s23 = ssub.s32 %s1871_s16, %s3352_s20 }
   0xa   : > { %p1667_p6 = scmp.ge.s32.totalorder %s1875_s17, 1  ;;  %p113_p7 = scmp.eq.s32.totalorder %s110_s23, 0 }
   0xb   : > { %p1953_p8 = por %p132_p5, %p131_p3  ;;  %p172_p9 = scmp.lt.s32.totalorder %s1875_s17, 3 }
   0xc   : > { %s1959_s25 = scalar_select %p113_p7, %s1863_s14, %s115_s21  }
   0xd   : > { %p173_p10 = pnand %p1667_p6, %p172_p9 }
   0xf   : > { %176 = sbr.rel (%p173_p10) target bundleno = 493 (0x1ed), region = 32 }
  0x14   : > { %s1669_s26 = sshll.u32 %s1867_s15, 3  ;;  %v230_v0 = vld [vmem:[%s3252_s1] sm:$0x3]  ;;  %vm248_vm0 = vcmask 1041408   ;;  %vm235_vm1 = vcmask 31744   ;;  %s200_s10 = sand.u32 1, %s1859_s13  }
  0x15   : > { %p204_p11 = scmp.lt.s32.totalorder %s1669_s26, 15  ;;  %v250_v1 = vsel %vm248_vm0, %v230_v0, 0  ;;  %v1971_v14 = vld [vmem:[%s3253_s2] ss:$0 sm:$0xff]  ;;  %v3270_v32 = vmov 683565275  }
  0x16   : > { %259 = vmatpush.bf16.msra.mxu0 %v250_v1  ;;  %1728 = vmatpush.bf16.msra.mxu1 %v250_v1  ;;  %v3260_v34 = vmov 2475754826   ;;  %v3268_v36 = vmov 2131351028   ;;  %v3258_v38 = vmov 2102212464  }
  0x17   : > { %s3354_s26 = smov (!%p204_p11, %s1669_s26), 15  ;;  %1729 = vmatpush.bf16.msra.mxu2 %v250_v1  ;;  %1730 = vmatpush.bf16.msra.mxu3 %v250_v1  ;;  %v3265_v40 = vmov 920167782   ;;  %v3263_v48 = vmov 1326507024   ;;  %s1668_s11 = sshll.u32 %s200_s10, 5 }
  0x18   : > { %s1670_s29 = sshll.u32 %s3354_s26, 3  ;;  %s3180_s18 = scalar_lea.vmem [#allocation2], %s1668_s11 }
  0x19   : > { %s207_s5 = scalar_lea.vmem %s3251_s0, %s1670_s29  ;;  %s1704_s19 = sshll.u32 %s1867_s15, 5 }
  0x1a   : > { %v218_v2 = vld [vmem:[%s207_s5] sm:$0xff]  ;;  %v219_v3 = vld [vmem:[%s207_s5 + $0x8] sm:$0xff]  ;;  %v220_v4 = vld [vmem:[%s207_s5 + $0x10] sm:$0xff]  ;;  %s1558_s26 = scalar_lea.hbm %s3254_s3, %s1704_s19  ;;  %s1559_s15 = sshll.u32 %s3180_s18, 4  ;;  %s1560_s15 = int_to_ptr.vmem [resolvable:$true] %s1559_s15 }
  0x1b   : > { %v221_v5 = vld [vmem:[%s207_s5 + $0x18] sm:$0xff]  ;;  %v222_v6 = vld [vmem:[%s207_s5 + $0x20] sm:$0xff]  ;;  %v223_v7 = vld [vmem:[%s207_s5 + $0x28] sm:$0xff]  ;;  %v226_v8 = vpack.c.bf16 %v219_v3, %v218_v2  ;;  %s1561_s27 = sshll.u32 %s1558_s26, 4  ;;  %s1546_s28 = scalar_lea.sflag [#allocation3], %s200_s10  ;;  %s1562_s27 = int_to_ptr.hbm [resolvable:$true] %s1561_s27 }
  0x1c   : > { %v224_v9 = vld [vmem:[%s207_s5 + $0x30] sm:$0xff]  ;;  %v225_v10 = vld [vmem:[%s207_s5 + $0x38] sm:$0xff]  ;;  %v227_v11 = vpack.c.bf16 %v221_v5, %v220_v4  ;;  %v228_v12 = vpack.c.bf16 %v223_v7, %v222_v6  ;;  %s1811_s29 = sshra.s32 %s1562_s27, 4  ;;  %s1817_s6 = scalar_lea.hbm %s3254_s3, 64  ;;  %s1812_s29 = int_to_ptr.hbm [resolvable:$true] %s1811_s29 }
  0x1d   : > { %v229_v13 = vpack.c.bf16 %v225_v10, %v224_v9  ;;  %1671 = vmatmul.msk.bf16.vlgmr.msra.gmra.mxu0 %vm235_vm1, %v226_v8  ;;  %s1813_s30 = scalar_lea.hbm %s1812_s29, 32  ;;  %p1818_p1 = scmp.lt.s32.totalorder %s1812_s29, %s3254_s3 }
  0x1e   : > { %1672 = vmatmul.msk.bf16.vlgmr.msra.gmra.mxu1 %vm235_vm1, %v227_v11  ;;  %1673 = vmatmul.msk.bf16.vlgmr.msra.gmra.mxu2 %vm235_vm1, %v228_v12  ;;  %p1814_p12 = scmp.ne.s32.totalorder %s1812_s29, %s1813_s30  ;;  %p1819_p2 = scmp.lt.s32.totalorder %s1817_s6, %s1813_s30 }
  0x1f   : > { %1674 = vmatmul.msk.bf16.vlgmr.msra.gmra.mxu3 %vm235_vm1, %v229_v13 }
  0x20   : > { %p1815_p13 = pnand %p1814_p12, %p1946_p4  ;;  %p1820_p3 = por %p1819_p2, %p1818_p1 }
  0x22   : > { %p1816_p0 = pneg %p1815_p13 }
  0x24   : > { %p1821_p5 = pnand %p1820_p3, %p1816_p0 }
  0x9a   : > { %v261_v15 = vpop.f32.mrf.mxu0 }
  0x9b   : > { %v262_v16 = vadd.f32 %v1971_v14, %v261_v15 }
  0x9d   : > { %v1974_v17 = vmul.f32 30.0, %v262_v16 }
  0x9f   : > { %3294 = vst [vmem:[#allocation5_spill] sm:$0xff] %v1974_v17  ;;  %v292_v18 = vand.u32 2139095040, %v1974_v17  ;;  %v289_v24 = vand.u32 2147483647, %v1974_v17 }
  0xa1   : > { %v293_v19 = vshrl.u32 %v292_v18, 23  ;;  %v296_v27 = vand.u32 8388607, %v289_v24 }
  0xa2   : > { %v263_v20 = vpop.f32.mrf.mxu0 }
  0xa3   : > { %v264_v21 = vadd.f32 %v1971_v14, %v263_v20  ;;  %v1675_v22 = vadd.s32 4294967169, %v293_v19  ;;  %v297_v42 = vor.u32 8388608, %v296_v27  ;;  %v3272_v27 = vmov 0  }
  0xa5   : > { %v1978_v23 = vmul.f32 30.0, %v264_v21  ;;  %v299_v25 = vadd.s32 1, %v1675_v22  ;;  %v2016_v56 = vshll.u32 %v297_v42, 8 }
  0xa7   : > { %3295 = vst [vmem:[#allocation6_spill] sm:$0xff] %v1978_v23  ;;  %vm300_vm2 = vcmp.gt.s32.totalorder %v299_v25, 0  ;;  %v447_v29 = vand.u32 2139095040, %v1978_v23  ;;  %v338_v2 = vand.u32 65535, %v2016_v56  ;;  %v339_v7 = vshrl.u32 %v2016_v56, 16 }
  0xa8   : > { %v301_v26 = vsel %vm300_vm2, %v299_v25, 0  ;;  %v266_v25 = vpop.f32.mrf.mxu1 }
  0xa9   : > { %v303_v28 = vand.u32 31, %v301_v26  ;;  %v1984_v30 = vshrl.u32 %v301_v26, 5  ;;  %v448_v45 = vshrl.u32 %v447_v29, 23 }
  0xab   : > { %v1986_v31 = vsub.s32 32, %v303_v28  ;;  %v306_v33 = vshll.u32 %v3270_v32, %v303_v28  ;;  %v309_v35 = vshll.u32 %v3260_v34, %v303_v28  ;;  %v312_v37 = vshll.u32 %v3268_v36, %v303_v28 }
  0xac   : > { %v315_v39 = vshll.u32 %v3258_v38, %v303_v28  ;;  %v318_v41 = vshll.u32 %v3265_v40, %v303_v28  ;;  %vm321_vm3 = vcmp.lt.s32.totalorder %v1984_v30, 1  ;;  %vm323_vm4 = vcmp.lt.s32.totalorder %v1984_v30, 3 }
  0xad   : > { %v307_v43 = vshrl.u32 %v3260_v34, %v1986_v31  ;;  %v310_v44 = vshrl.u32 %v3268_v36, %v1986_v31  ;;  %v313_v46 = vshrl.u32 %v3258_v38, %v1986_v31  ;;  %v316_v47 = vshrl.u32 %v3265_v40, %v1986_v31 }
  0xae   : > { %v319_v49 = vshrl.u32 %v3263_v48, %v1986_v31  ;;  %vm324_vm5 = vcmp.lt.s32.totalorder %v1984_v30, 4  ;;  %v1678_v57 = vadd.s32 4294967169, %v448_v45  ;;  %vm322_vm6 = vcmp.lt.s32.totalorder %v1984_v30, 2 }
  0xaf   : > { %v2004_v50 = vor.u32 %v307_v43, %v306_v33  ;;  %v2006_v51 = vor.u32 %v310_v44, %v309_v35  ;;  %v2009_v52 = vor.u32 %v313_v46, %v312_v37  ;;  %v317_v53 = vor.u32 %v316_v47, %v315_v39 }
  0xb0   : > { %v320_v54 = vor.u32 %v319_v49, %v318_v41  ;;  %v454_v1 = vadd.s32 1, %v1678_v57  ;;  %v267_v37 = vadd.f32 %v1971_v14, %v266_v25  ;;  %v444_v41 = vand.u32 2147483647, %v1978_v23 }
  0xb1   : > { %v329_v55 = vsel %vm321_vm3, %v2004_v50, %v2006_v51  ;;  %v330_v58 = vsel %vm324_vm5, %v317_v53, 920167782  ;;  %v333_v59 = vsel %vm321_vm3, %v2006_v51, %v2009_v52 }
  0xb2   : > { %v334_v60 = vsel %vm324_vm5, %v320_v54, 1326507024  ;;  %v331_v61 = vsel %vm323_vm4, %v2009_v52, %v330_v58  ;;  %vm455_vm7 = vcmp.gt.s32.totalorder %v454_v1, 0 }
  0xb3   : > { %v335_v62 = vsel %vm323_vm4, %v317_v53, %v334_v60  ;;  %v332_v63 = vsel %vm322_vm6, %v329_v55, %v331_v61  ;;  %v456_v19 = vsel %vm455_vm7, %v454_v1, 0 }
  0xb4   : > { %v336_v0 = vsel %vm322_vm6, %v333_v59, %v335_v62  ;;  %v363_v5 = vshrl.u32 %v332_v63, 16  ;;  %v362_v6 = vand.u32 65535, %v332_v63  ;;  %v458_v22 = vand.u32 31, %v456_v19 }
  0xb5   : > { %v340_v3 = vand.u32 65535, %v336_v0  ;;  %v341_v4 = vshrl.u32 %v336_v0, 16  ;;  %v2056_v44 = vshrl.u32 %v456_v19, 5  ;;  %v2071_v59 = vmul.f32 30.0, %v267_v37 }
  0xb6   : > { %v365_v9 = vmul.u32 %v363_v5, %v338_v2  ;;  %v364_v13 = vmul.u32 %v362_v6, %v338_v2  ;;  %v2040_v15 = vmul.u32 %v362_v6, %v339_v7  ;;  %v2047_v29 = vsub.s32 32, %v458_v22 }
  0xb7   : > { %v343_v8 = vmul.u32 %v341_v4, %v338_v2  ;;  %v342_v10 = vmul.u32 %v340_v3, %v338_v2  ;;  %v2038_v11 = vmul.u32 %v340_v3, %v339_v7  ;;  %v345_v33 = vmul.u32 %v341_v4, %v339_v7  ;;  %3296 = vst [vmem:[#allocation7_spill] sm:$0xff] %v2071_v59 }
  0xb8   : > { %v368_v16 = vshll.u32 %v365_v9, 16  ;;  %v370_v26 = vshll.u32 %v2040_v15, 16  ;;  %v367_v39 = vmul.u32 %v363_v5, %v339_v7  ;;  %v471_v45 = vshrl.u32 %v3265_v40, %v2047_v29 }
  0xb9   : > { %v346_v12 = vshll.u32 %v343_v8, 16  ;;  %v348_v21 = vshll.u32 %v2038_v11, 16  ;;  %v470_v49 = vshll.u32 %v3258_v38, %v458_v22  ;;  %v474_v53 = vshrl.u32 %v3263_v48, %v2047_v29 }
  0xba   : > { %v2042_v20 = vadd.s32 %v368_v16, %v364_v13  ;;  %vm372_vm9 = vc.u32 %v364_v13, %v368_v16  ;;  %v462_v54 = vshrl.u32 %v3260_v34, %v2047_v29  ;;  %v465_v55 = vshrl.u32 %v3268_v36, %v2047_v29 }
  0xbb   : > { %v352_v18 = vadd.s32 %v346_v12, %v342_v10  ;;  %vm350_vm8 = vc.u32 %v342_v10, %v346_v12  ;;  %v373_v35 = vsel %vm372_vm9, 1, %v3272_v27  ;;  %v468_v57 = vshrl.u32 %v3258_v38, %v2047_v29 }
  0xbc   : > { %v351_v28 = vsel %vm350_vm8, 1, %v3272_v27  ;;  %vm376_vm11 = vc.u32 %v2042_v20, %v370_v26  ;;  %v375_v46 = vadd.s32 %v373_v35, %v367_v39  ;;  %v473_v58 = vshll.u32 %v3265_v40, %v458_v22 }
  0xbd   : > { %vm354_vm10 = vc.u32 %v352_v18, %v348_v21  ;;  %v353_v42 = vadd.s32 %v351_v28, %v345_v33  ;;  %v377_v47 = vsel %vm376_vm11, 1, %v3272_v27  ;;  %v472_v60 = vor.u32 %v471_v45, %v470_v49 }
  0xbe   : > { %v355_v43 = vsel %vm354_vm10, 1, %v3272_v27  ;;  %v461_v61 = vshll.u32 %v3270_v32, %v458_v22  ;;  %v464_v62 = vshll.u32 %v3260_v34, %v458_v22  ;;  %v467_v63 = vshll.u32 %v3268_v36, %v458_v22 }
  0xbf   : > { %v475_v0 = vor.u32 %v474_v53, %v473_v58  ;;  %v357_v1 = vadd.s32 %v355_v43, %v353_v42  ;;  %v379_v2 = vadd.s32 %v377_v47, %v375_v46  ;;  %v451_v3 = vand.u32 8388607, %v444_v41 }
  0xc0   : > { %v2078_v4 = vor.u32 %v462_v54, %v461_v61  ;;  %v2080_v5 = vor.u32 %v465_v55, %v464_v62  ;;  %v2082_v6 = vor.u32 %v468_v57, %v467_v63  ;;  %vm479_vm12 = vcmp.lt.s32.totalorder %v2056_v44, 4 }
  0xc1   : > { %v369_v7 = vshrl.u32 %v365_v9, 16  ;;  %v485_v10 = vsel %vm479_vm12, %v472_v60, 920167782  ;;  %v602_v12 = vand.u32 2139095040, %v2071_v59  ;;  %v347_v13 = vshrl.u32 %v343_v8, 16 }
  0xc2   : > { %v489_v16 = vsel %vm479_vm12, %v475_v0, 1326507024  ;;  %vm476_vm13 = vcmp.lt.s32.totalorder %v2056_v44, 1  ;;  %vm478_vm14 = vcmp.lt.s32.totalorder %v2056_v44, 3  ;;  %v452_v21 = vor.u32 8388608, %v451_v3 }
  0xc3   : > { %v380_v18 = vadd.s32 %v379_v2, %v369_v7  ;;  %v358_v19 = vadd.s32 %v357_v1, %v347_v13  ;;  %v484_v9 = vsel %vm476_vm13, %v2078_v4, %v2080_v5  ;;  %v486_v22 = vsel %vm478_vm14, %v2082_v6, %v485_v10 }
  0xc4   : > { %v371_v8 = vshrl.u32 %v2040_v15, 16  ;;  %v488_v25 = vsel %vm476_vm13, %v2080_v5, %v2082_v6  ;;  %v490_v28 = vsel %vm478_vm14, %v472_v60, %v489_v16  ;;  %v603_v33 = vshrl.u32 %v602_v12, 23 }
  0xc5   : > { %v305_v35 = vshrl.u32 %v3270_v32, %v1986_v31  ;;  %v349_v37 = vshrl.u32 %v2038_v11, 16  ;;  %vm477_vm15 = vcmp.lt.s32.totalorder %v2056_v44, 2  ;;  %v326_v39 = vsel %vm324_vm5, %v2009_v52, 2102212464 }
  0xc6   : > { %v381_v42 = vadd.s32 %v380_v18, %v371_v8  ;;  %v487_v43 = vsel %vm477_vm15, %v484_v9, %v486_v22  ;;  %v491_v46 = vsel %vm477_vm15, %v488_v25, %v490_v28  ;;  %v2119_v47 = vshll.u32 %v452_v21, 8 }
  0xc7   : > { %v2115_v45 = vadd.s32 %v358_v19, %v349_v37  ;;  %v1681_v31 = vadd.s32 4294967169, %v603_v33  ;;  %v325_v11 = vsel %vm321_vm3, %v305_v35, %v2004_v50  ;;  %v327_v52 = vsel %vm323_vm4, %v2006_v51, %v326_v39 }
  0xc8   : > { %v2130_v49 = vadd.s32 %v2042_v20, %v370_v26  ;;  %v518_v53 = vshrl.u32 %v487_v43, 16  ;;  %v385_v54 = vadd.s32 1, %v381_v42  ;;  %v496_v55 = vshrl.u32 %v491_v46, 16 }
  0xc9   : > { %v493_v57 = vand.u32 65535, %v2119_v47  ;;  %v328_v50 = vsel %vm322_vm6, %v325_v11, %v327_v52  ;;  %v609_v60 = vadd.s32 1, %v1681_v31  ;;  %v517_v62 = vand.u32 65535, %v487_v43 }
  0xca   : > { %vm384_vm0 = vc.u32 %v2115_v45, %v2130_v49  ;;  %v382_v15 = vmul.u32 %v2016_v56, %v328_v50  ;;  %v495_v20 = vand.u32 65535, %v491_v46  ;;  %v494_v63 = vshrl.u32 %v2119_v47, 16 }
  0xcb   : > { %v520_v58 = vmul.u32 %v518_v53, %v493_v57  ;;  %v386_v61 = vsel %vm384_vm0, %v385_v54, %v381_v42  ;;  %v498_v51 = vmul.u32 %v496_v55, %v493_v57  ;;  %vm610_vm1 = vcmp.gt.s32.totalorder %v609_v60, 0 }
  0xcc   : > { %v387_v26 = vadd.s32 %v386_v61, %v382_v15  ;;  %v519_v2 = vmul.u32 %v517_v62, %v493_v57  ;;  %v2139_v3 = vmul.u32 %v517_v62, %v494_v63  ;;  %v497_v7 = vmul.u32 %v495_v20, %v493_v57 }
  0xcd   : > { %v523_v0 = vshll.u32 %v520_v58, 16  ;;  %v501_v1 = vshll.u32 %v498_v51, 16  ;;  %v499_v30 = vmul.u32 %v495_v20, %v494_v63  ;;  %v611_v10 = vsel %vm610_vm1, %v609_v60, 0 }
  0xce   : > { %v388_v12 = vadd.s32 536870912, %v387_v26  ;;  %v525_v16 = vshll.u32 %v2139_v3, 16  ;;  %v613_v18 = vand.u32 31, %v611_v10  ;;  %v522_v8 = vmul.u32 %v518_v53, %v494_v63 }
  0xcf   : > { %vm527_vm2 = vc.u32 %v519_v2, %v523_v0  ;;  %v2141_v13 = vadd.s32 %v523_v0, %v519_v2  ;;  %vm505_vm3 = vc.u32 %v497_v7, %v501_v1  ;;  %v507_v56 = vadd.s32 %v501_v1, %v497_v7 }
  0xd0   : > { %v503_v19 = vshll.u32 %v499_v30, 16  ;;  %v528_v21 = vsel %vm527_vm2, 1, %v3272_v27  ;;  %v2145_v9 = vshrl.u32 %v388_v12, 30  ;;  %v506_v22 = vsel %vm505_vm3, 1, %v3272_v27 }
  0xd1   : > { %vm531_vm4 = vc.u32 %v2141_v13, %v525_v16  ;;  %v500_v25 = vmul.u32 %v496_v55, %v494_v63  ;;  %v530_v28 = vadd.s32 %v528_v21, %v522_v8  ;;  %v2149_v33 = vsub.s32 32, %v613_v18 }
  0xd2   : > { %vm509_vm5 = vc.u32 %v507_v56, %v503_v19  ;;  %v532_v37 = vsel %vm531_vm4, 1, %v3272_v27  ;;  %v390_v39 = vshll.u32 %v2145_v9, 30  ;;  %v3257_v43 = vand.u32 2147483647, %v2071_v59 }
  0xd3   : > { %v508_v35 = vadd.s32 %v506_v22, %v500_v25  ;;  %v510_v42 = vsel %vm509_vm5, 1, %v3272_v27  ;;  %v534_v46 = vadd.s32 %v532_v37, %v530_v28  ;;  %v628_v31 = vshll.u32 %v3265_v40, %v613_v18 }
  0xd4   : > { %v629_v11 = vshrl.u32 %v3263_v48, %v2149_v33  ;;  %v2158_v53 = vshrl.u32 %v611_v10, 5  ;;  %v625_v54 = vshll.u32 %v3258_v38, %v613_v18  ;;  %v626_v55 = vshrl.u32 %v3265_v40, %v2149_v33 }
  0xd5   : > { %v512_v52 = vadd.s32 %v510_v42, %v508_v35  ;;  %v2163_v57 = vsub.s32 %v387_v26, %v390_v39  ;;  %v502_v50 = vshrl.u32 %v498_v51, 16  ;;  %v524_v60 = vshrl.u32 %v520_v58, 16  ;;  %v268_v35 = vpop.f32.mrf.mxu1 }
  0xd6   : > { %v606_v61 = vand.u32 8388607, %v3257_v43  ;;  %v619_v15 = vshll.u32 %v3260_v34, %v613_v18  ;;  %v620_v62 = vshrl.u32 %v3268_v36, %v2149_v33  ;;  %v622_v20 = vshll.u32 %v3268_v36, %v613_v18 }
  0xd7   : > { %v623_v63 = vshrl.u32 %v3258_v38, %v2149_v33  ;;  %v535_v0 = vadd.s32 %v534_v46, %v524_v60  ;;  %v616_v1 = vshll.u32 %v3270_v32, %v613_v18  ;;  %v617_v51 = vshrl.u32 %v3260_v34, %v2149_v33 }
  0xd8   : > { %v630_v58 = vor.u32 %v629_v11, %v628_v31  ;;  %v460_v26 = vshrl.u32 %v3270_v32, %v2047_v29  ;;  %v513_v2 = vadd.s32 %v512_v52, %v502_v50  ;;  %v627_v7 = vor.u32 %v626_v55, %v625_v54 }
  0xd9   : > { %vm634_vm6 = vcmp.lt.s32.totalorder %v2158_v53, 4  ;;  %vm392_vm7 = vcmp.lt.s32.totalorder %v2163_v57, 0  ;;  %v481_v10 = vsel %vm479_vm12, %v2082_v6, 2102212464  ;;  %v504_v12 = vshrl.u32 %v499_v30, 16 }
  0xda   : > { %v526_v56 = vshrl.u32 %v2139_v3, 16  ;;  %v393_v18 = vsub.s32 0, %v2163_v57  ;;  %v2185_v19 = vor.u32 %v620_v62, %v619_v15  ;;  %v2187_v21 = vor.u32 %v623_v63, %v622_v20 }
  0xdb   : > { %vm631_vm8 = vcmp.lt.s32.totalorder %v2158_v53, 1  ;;  %v2190_v22 = vor.u32 %v617_v51, %v616_v1  ;;  %vm633_vm9 = vcmp.lt.s32.totalorder %v2158_v53, 3  ;;  %v644_v8 = vsel %vm634_vm6, %v630_v58, 1326507024 }
  0xdc   : > { %v536_v29 = vadd.s32 %v535_v0, %v526_v56  ;;  %v2195_v6 = vadd.s32 %v513_v2, %v504_v12  ;;  %v640_v3 = vsel %vm634_vm6, %v627_v7, 920167782  ;;  %v480_v30 = vsel %vm476_vm13, %v460_v26, %v2078_v4  ;;  %v271_v2 = vpop.f32.mrf.mxu2 }
  0xdd   : > { %v482_v25 = vsel %vm478_vm14, %v2080_v5, %v481_v10  ;;  %v607_v28 = vor.u32 8388608, %v606_v61  ;;  %v394_v37 = vsel %vm392_vm7, %v393_v18, %v2163_v57  ;;  %v2209_v39 = vadd.s32 %v2141_v13, %v525_v16 }
  0xde   : > { %v643_v42 = vsel %vm631_vm8, %v2185_v19, %v2187_v21  ;;  %v645_v4 = vsel %vm633_vm9, %v627_v7, %v644_v8  ;;  %v540_v46 = vadd.s32 1, %v536_v29  ;;  %v639_v5 = vsel %vm631_vm8, %v2190_v22, %v2185_v19 }
  0xdf   : > { %v641_v31 = vsel %vm633_vm9, %v2187_v21, %v640_v3  ;;  %vm539_vm10 = vc.u32 %v2195_v6, %v2209_v39  ;;  %vm632_vm11 = vcmp.lt.s32.totalorder %v2158_v53, 2  ;;  %v269_v13 = vadd.f32 %v1971_v14, %v268_v35 }
  0xe0   : > { %v395_v16 = vclz %v394_v37  ;;  %v483_v11 = vsel %vm477_vm15, %v480_v30, %v482_v25  ;;  %v646_v52 = vsel %vm632_vm11, %v643_v42, %v645_v4  ;;  %v642_v54 = vsel %vm632_vm11, %v639_v5, %v641_v31 }
  0xe1   : > { %v2234_v55 = vshll.u32 %v607_v28, 8  ;;  %v541_v50 = vsel %vm539_vm10, %v540_v46, %v536_v29  ;;  %v537_v60 = vmul.u32 %v2119_v47, %v483_v11  ;;  %v651_v61 = vshrl.u32 %v646_v52, 16 }
  0xe2   : > { %v2237_v15 = vmul.f32 30.0, %v269_v13  ;;  %v1676_v62 = vadd.s32 4294967294, %v395_v16  ;;  %v673_v20 = vshrl.u32 %v642_v54, 16  ;;  %v650_v26 = vand.u32 65535, %v646_v52 }
  0xe3   : > { %v542_v63 = vadd.s32 %v541_v50, %v537_v60  ;;  %v648_v44 = vand.u32 65535, %v2234_v55  ;;  %v672_v7 = vand.u32 65535, %v642_v54  ;;  %v649_v12 = vshrl.u32 %v2234_v55, 16 }
  0xe4   : > { %vm1677_vm12 = vcmp.lt.s32.totalorder %v1676_v62, 0  ;;  %v757_v51 = vand.u32 2139095040, %v2237_v15  ;;  %v272_v8 = vadd.f32 %v1971_v14, %v271_v2  ;;  %v383_v4 = vadd.s32 %v2130_v49, %v2115_v45 }
  0xe5   : > { %v2240_v0 = vmul.u32 %v651_v61, %v648_v44  ;;  %v2242_v1 = vmul.u32 %v673_v20, %v648_v44  ;;  %v543_v58 = vadd.s32 536870912, %v542_v63  ;;  %v398_v10 = vsel %vm1677_vm12, 0, %v1676_v62 }
  0xe6   : > { %v758_v47 = vshrl.u32 %v757_v51, 23  ;;  %v652_v30 = vmul.u32 %v650_v26, %v648_v44  ;;  %v2251_v25 = vmul.u32 %v650_v26, %v649_v12  ;;  %v399_v28 = vsub.s32 32, %v398_v10 }
  0xe7   : > { %v656_v56 = vshll.u32 %v2240_v0, 16  ;;  %v678_v18 = vshll.u32 %v2242_v1, 16  ;;  %v2249_v3 = vshrl.u32 %v543_v58, 30  ;;  %v674_v35 = vmul.u32 %v672_v7, %v648_v44 }
  0xe8   : > { %v1684_v29 = vadd.s32 4294967169, %v758_v47  ;;  %v2253_v37 = vmul.u32 %v672_v7, %v649_v12  ;;  %v403_v5 = vsub.s32 4294967266, %v398_v10  ;;  %v2259_v13 = vmul.f32 30.0, %v272_v8 }
  0xe9   : > { %vm660_vm13 = vc.u32 %v652_v30, %v656_v56  ;;  %v662_v46 = vadd.s32 %v656_v56, %v652_v30  ;;  %vm682_vm14 = vc.u32 %v674_v35, %v678_v18  ;;  %v2257_v31 = vadd.s32 %v678_v18, %v674_v35 }
  0xea   : > { %v764_v42 = vadd.s32 1, %v1684_v29  ;;  %v545_v16 = vshll.u32 %v2249_v3, 30  ;;  %v658_v11 = vshll.u32 %v2251_v25, 16  ;;  %v401_v54 = vshrl.u32 %v383_v4, %v399_v28 }
  0xeb   : > { %v661_v50 = vsel %vm660_vm13, 1, %v3272_v27  ;;  %v680_v60 = vshll.u32 %v2253_v37, 16  ;;  %v655_v49 = vmul.u32 %v651_v61, %v649_v12  ;;  %v683_v62 = vsel %vm682_vm14, 1, %v3272_v27 }
  0xec   : > { %vm765_vm15 = vcmp.gt.s32.totalorder %v764_v42, 0  ;;  %vm664_vm0 = vc.u32 %v662_v46, %v658_v11  ;;  %v3256_v44 = vand.u32 2147483647, %v2237_v15  ;;  %v404_v51 = vadd.s32 127, %v403_v5 }
  0xed   : > { %v766_v52 = vsel %vm765_vm15, %v764_v42, 0  ;;  %v677_v58 = vmul.u32 %v673_v20, %v649_v12  ;;  %vm686_vm1 = vc.u32 %v2257_v31, %v680_v60  ;;  %v2272_v2 = vsub.s32 %v542_v63, %v545_v16 }
  0xee   : > { %v768_v45 = vand.u32 31, %v766_v52  ;;  %v663_v7 = vadd.s32 %v661_v50, %v655_v49  ;;  %v400_v47 = vshll.u32 %v2163_v57, %v398_v10  ;;  %v665_v61 = vsel %vm664_vm0, 1, %v3272_v27 }
  0xef   : > { %v685_v56 = vadd.s32 %v683_v62, %v677_v58  ;;  %v615_v18 = vshrl.u32 %v3270_v32, %v2149_v33  ;;  %v687_v29 = vsel %vm686_vm1, 1, %v3272_v27  ;;  %v761_v20 = vand.u32 8388607, %v3256_v44 }
  0xf0   : > { %v2270_v26 = vsub.s32 32, %v768_v45  ;;  %v912_v12 = vand.u32 2139095040, %v2259_v13  ;;  %v2282_v8 = vor.u32 %v401_v54, %v400_v47  ;;  %v405_v63 = vshll.u32 %v404_v51, 23 }
  0xf1   : > { %vm547_vm2 = vcmp.lt.s32.totalorder %v2272_v2, 0  ;;  %v548_v33 = vsub.s32 0, %v2272_v2  ;;  %v667_v10 = vadd.s32 %v665_v61, %v663_v7  ;;  %v689_v35 = vadd.s32 %v687_v29, %v685_v56 }
  0xf2   : > { %v772_v30 = vshrl.u32 %v3260_v34, %v2270_v26  ;;  %v775_v57 = vshrl.u32 %v3268_v36, %v2270_v26  ;;  %v781_v28 = vshrl.u32 %v3265_v40, %v2270_v26  ;;  %v771_v42 = vshll.u32 %v3270_v32, %v768_v45 }
  0xf3   : > { %v774_v4 = vshll.u32 %v3260_v34, %v768_v45  ;;  %v778_v46 = vshrl.u32 %v3258_v38, %v2270_v26  ;;  %v762_v5 = vor.u32 8388608, %v761_v20  ;;  %v2296_v16 = vshrl.u32 %v766_v52, 5 }
  0xf4   : > { %v780_v11 = vshll.u32 %v3258_v38, %v768_v45  ;;  %v913_v54 = vshrl.u32 %v912_v12, 23  ;;  %v2299_v50 = vor.u32 %v772_v30, %v771_v42  ;;  %v777_v62 = vshll.u32 %v3268_v36, %v768_v45 }
  0xf5   : > { %v2301_v49 = vor.u32 %v775_v57, %v774_v4  ;;  %v784_v51 = vshrl.u32 %v3263_v48, %v2270_v26  ;;  %v406_v58 = vor.u32 4788187, %v405_v63  ;;  %v657_v7 = vshrl.u32 %v2240_v0, 16 }
  0xf6   : > { %v679_v47 = vshrl.u32 %v2242_v1, 16  ;;  %v782_v61 = vor.u32 %v781_v28, %v780_v11  ;;  %v549_v52 = vsel %vm547_vm2, %v548_v33, %v2272_v2  ;;  %v636_v56 = vsel %vm634_vm6, %v2187_v21, 2102212464 }
  0xf7   : > { %v2314_v29 = vor.u32 %v778_v46, %v777_v62  ;;  %v783_v20 = vshll.u32 %v3265_v40, %v768_v45  ;;  %v668_v12 = vadd.s32 %v667_v10, %v657_v7  ;;  %vm786_vm3 = vcmp.lt.s32.totalorder %v2296_v16, 1 }
  0xf8   : > { %v690_v30 = vadd.s32 %v689_v35, %v679_v47  ;;  %v2318_v0 = vshll.u32 %v762_v5, 8  ;;  %vm789_vm4 = vcmp.lt.s32.totalorder %v2296_v16, 4  ;;  %v794_v63 = vsel %vm786_vm3, %v2299_v50, %v2301_v49 }
  0xf9   : > { %v785_v1 = vor.u32 %v784_v51, %v783_v20  ;;  %v1687_v57 = vadd.s32 4294967169, %v913_v54  ;;  %v659_v21 = vshrl.u32 %v2251_v25, 16  ;;  %v681_v33 = vshrl.u32 %v2253_v37, 16 }
  0xfa   : > { %vm788_vm5 = vcmp.lt.s32.totalorder %v2296_v16, 3  ;;  %v795_v45 = vsel %vm789_vm4, %v782_v61, 920167782  ;;  %v407_v10 = vand.u32 2147483647, %v406_v58  ;;  %v550_v28 = vclz %v549_v52 }
  0xfb   : > { %vm787_vm6 = vcmp.lt.s32.totalorder %v2296_v16, 2  ;;  %v796_v35 = vsel %vm788_vm5, %v2314_v29, %v795_v45  ;;  %v2334_v42 = vadd.s32 %v668_v12, %v659_v21  ;;  %v691_v4 = vadd.s32 %v690_v30, %v681_v33 }
  0xfc   : > { %v797_v25 = vsel %vm787_vm6, %v794_v63, %v796_v35  ;;  %v798_v46 = vsel %vm786_vm3, %v2301_v49, %v2314_v29  ;;  %v799_v5 = vsel %vm789_vm4, %v785_v1, 1326507024  ;;  %v803_v11 = vand.u32 65535, %v2318_v0 }
  0xfd   : > { %v828_v54 = vshrl.u32 %v797_v25, 16  ;;  %v919_v62 = vadd.s32 1, %v1687_v57  ;;  %v409_v51 = vcvt.s32.f32 %v2282_v8  ;;  %v635_v58 = vsel %vm631_vm8, %v615_v18, %v2190_v22 }
  0xfe   : > { %v637_v7 = vsel %vm633_vm9, %v2185_v19, %v636_v56  ;;  %v800_v47 = vsel %vm788_vm5, %v782_v61, %v799_v5  ;;  %v1679_v52 = vadd.s32 4294967294, %v550_v28  ;;  %v2357_v20 = vadd.s32 %v2257_v31, %v680_v60 }
  0xff   : > { %v801_v8 = vsel %vm787_vm6, %v798_v46, %v800_v47  ;;  %v2361_v12 = vmul.u32 %v828_v54, %v803_v11  ;;  %v695_v30 = vadd.s32 1, %v691_v4  ;;  %v410_v18 = vmul.f32 %v409_v51, %v407_v10 }
 0x100   : > { %v806_v22 = vshrl.u32 %v801_v8, 16  ;;  %vm694_vm7 = vc.u32 %v2334_v42, %v2357_v20  ;;  %v827_v19 = vand.u32 65535, %v797_v25  ;;  %vm920_vm8 = vcmp.gt.s32.totalorder %v919_v62, 0 }
 0x101   : > { %v638_v61 = vsel %vm632_vm11, %v635_v58, %v637_v7  ;;  %v805_v37 = vand.u32 65535, %v801_v8  ;;  %vm1680_vm9 = vcmp.lt.s32.totalorder %v1679_v52, 0  ;;  %v804_v31 = vshrl.u32 %v2318_v0, 16 }
 0x102   : > { %v2367_v56 = vmul.u32 %v806_v22, %v803_v11  ;;  %v833_v60 = vshll.u32 %v2361_v12, 16  ;;  %v696_v1 = vsel %vm694_vm7, %v695_v30, %v691_v4  ;;  %v921_v57 = vsel %vm920_vm8, %v919_v62, 0 }
 0x103   : > { %v411_v21 = vxor.u32 2147483648, %v410_v18  ;;  %v692_v33 = vmul.u32 %v2234_v55, %v638_v61  ;;  %v829_v45 = vmul.u32 %v827_v19, %v803_v11  ;;  %v2373_v10 = vmul.u32 %v827_v19, %v804_v31 }
 0x104   : > { %v811_v63 = vshll.u32 %v2367_v56, 16  ;;  %v2375_v53 = vsel %vm1680_vm9, 0, %v1679_v52  ;;  %v807_v28 = vmul.u32 %v805_v37, %v803_v11  ;;  %v2377_v35 = vmul.u32 %v805_v37, %v804_v31 }
 0x105   : > { %v2379_v25 = vadd.s32 %v696_v1, %v692_v33  ;;  %vm837_vm10 = vc.u32 %v829_v45, %v833_v60  ;;  %v2381_v46 = vadd.s32 %v833_v60, %v829_v45  ;;  %v923_v4 = vand.u32 31, %v921_v57 }
 0x106   : > { %vm291_vm11 = vcmp.lt.s32.totalorder %v1974_v17, 0  ;;  %vm815_vm12 = vc.u32 %v807_v28, %v811_v63  ;;  %v817_v5 = vadd.s32 %v811_v63, %v807_v28  ;;  %v558_v62 = vsub.s32 4294967266, %v2375_v53 }
 0x107   : > { %v412_v55 = vsel %vm291_vm11, %v411_v21, %v410_v18  ;;  %v835_v51 = vshll.u32 %v2373_v10, 16  ;;  %v2388_v11 = vsub.s32 32, %v923_v4  ;;  %vm2392_vm13 = vcmp.le.f32.partialorder %v289_v24, 0.7853982 }
 0x108   : > { %v813_v7 = vshll.u32 %v2377_v35, 16  ;;  %v838_v47 = vsel %vm837_vm10, 1, %v3272_v27  ;;  %v3255_v52 = vand.u32 2147483647, %v2259_v13  ;;  %v698_v8 = vadd.s32 536870912, %v2379_v25 }
 0x109   : > { %v816_v30 = vsel %vm815_vm12, 1, %v3272_v27  ;;  %v832_v18 = vmul.u32 %v828_v54, %v804_v31  ;;  %vm841_vm14 = vc.u32 %v2381_v46, %v835_v51  ;;  %v2407_v24 = vsel %vm2392_vm13, %v1974_v17, %v412_v55 }
 0x10a   : > { %v538_v19 = vadd.s32 %v2209_v39, %v2195_v6  ;;  %v810_v61 = vmul.u32 %v806_v22, %v804_v31  ;;  %vm819_vm15 = vc.u32 %v817_v5, %v813_v7  ;;  %v554_v37 = vsub.s32 32, %v2375_v53 }
 0x10b   : > { %v559_v60 = vadd.s32 127, %v558_v62  ;;  %v840_v1 = vadd.s32 %v838_v47, %v832_v18  ;;  %v936_v54 = vshrl.u32 %v3265_v40, %v2388_v11  ;;  %v842_v21 = vsel %vm841_vm14, 1, %v3272_v27 }
 0x10c   : > { %v818_v63 = vadd.s32 %v816_v30, %v810_v61  ;;  %v930_v33 = vshrl.u32 %v3268_v36, %v2388_v11  ;;  %v933_v45 = vshrl.u32 %v3258_v38, %v2388_v11  ;;  %v2419_v28 = vshrl.u32 %v698_v8, 30 }
 0x10d   : > { %v820_v6 = vsel %vm819_vm15, 1, %v3272_v27  ;;  %v916_v39 = vand.u32 8388607, %v3255_v52  ;;  %v935_v22 = vshll.u32 %v3258_v38, %v923_v4  ;;  %v2425_v31 = vshrl.u32 %v921_v57, 5 }
 0x10e   : > { %v927_v5 = vshrl.u32 %v3260_v34, %v2388_v11  ;;  %v929_v55 = vshll.u32 %v3260_v34, %v923_v4  ;;  %v932_v62 = vshll.u32 %v3268_v36, %v923_v4  ;;  %v844_v7 = vadd.s32 %v842_v21, %v840_v1 }
 0x10f   : > { %v937_v47 = vor.u32 %v936_v54, %v935_v22  ;;  %v938_v8 = vshll.u32 %v3265_v40, %v923_v4  ;;  %v939_v30 = vshrl.u32 %v3263_v48, %v2388_v11  ;;  %v822_v18 = vadd.s32 %v820_v6, %v818_v63 }
 0x110   : > { %v926_v61 = vshll.u32 %v3270_v32, %v923_v4  ;;  %v2435_v52 = vor.u32 %v930_v33, %v929_v55  ;;  %v2437_v57 = vor.u32 %v933_v45, %v932_v62  ;;  %v560_v44 = vshll.u32 %v559_v60, 23 }
 0x111   : > { %v834_v43 = vshrl.u32 %v2361_v12, 16  ;;  %v917_v38 = vor.u32 8388608, %v916_v39  ;;  %v940_v34 = vor.u32 %v939_v30, %v938_v8  ;;  %v700_v1 = vshll.u32 %v2419_v28, 30  ;;  %v273_v30 = vpop.f32.mrf.mxu2 }
 0x112   : > { %v812_v54 = vshrl.u32 %v2367_v56, 16  ;;  %v2442_v21 = vor.u32 %v927_v5, %v926_v61  ;;  %vm944_vm0 = vcmp.lt.s32.totalorder %v2425_v31, 4  ;;  %vm941_vm1 = vcmp.lt.s32.totalorder %v2425_v31, 1 }
 0x113   : > { %v845_v63 = vadd.s32 %v844_v7, %v834_v43  ;;  %v950_v4 = vsel %vm944_vm0, %v937_v47, 920167782  ;;  %v954_v60 = vsel %vm944_vm0, %v940_v34, 1326507024  ;;  %v770_v12 = vshrl.u32 %v3270_v32, %v2270_v26 }
 0x114   : > { %v823_v33 = vadd.s32 %v822_v18, %v812_v54  ;;  %vm943_vm2 = vcmp.lt.s32.totalorder %v2425_v31, 3  ;;  %v953_v56 = vsel %vm941_vm1, %v2435_v52, %v2437_v57  ;;  %v791_v43 = vsel %vm789_vm4, %v2314_v29, 2102212464 }
 0x115   : > { %v836_v45 = vshrl.u32 %v2373_v10, 16  ;;  %v955_v34 = vsel %vm943_vm2, %v937_v47, %v954_v60  ;;  %v2463_v6 = vshll.u32 %v917_v38, 8  ;;  %v814_v26 = vshrl.u32 %v2377_v35, 16 }
 0x116   : > { %vm942_vm7 = vcmp.lt.s32.totalorder %v2425_v31, 2  ;;  %v949_v39 = vsel %vm941_vm1, %v2442_v21, %v2435_v52  ;;  %v951_v29 = vsel %vm943_vm2, %v2437_v57, %v950_v4  ;;  %v555_v22 = vshll.u32 %v2272_v2, %v2375_v53 }
 0x117   : > { %v556_v5 = vshrl.u32 %v538_v19, %v554_v37  ;;  %v846_v55 = vadd.s32 %v845_v63, %v836_v45  ;;  %v956_v38 = vsel %vm942_vm7, %v953_v56, %v955_v34  ;;  %v2479_v35 = vsub.s32 %v2379_v25, %v700_v1 }
 0x118   : > { %v790_v62 = vsel %vm786_vm3, %v770_v12, %v2299_v50  ;;  %v792_v7 = vsel %vm788_vm5, %v2301_v49, %v791_v43  ;;  %v2487_v47 = vadd.s32 %v823_v33, %v814_v26  ;;  %v952_v2 = vsel %vm942_vm7, %v949_v39, %v951_v29 }
 0x119   : > { %v958_v53 = vand.u32 65535, %v2463_v6  ;;  %v960_v19 = vand.u32 65535, %v956_v38  ;;  %v961_v37 = vshrl.u32 %v956_v38, 16  ;;  %v561_v8 = vor.u32 4788187, %v560_v44 }
 0x11a   : > { %v2495_v25 = vadd.s32 %v2381_v46, %v835_v51  ;;  %v959_v50 = vshrl.u32 %v2463_v6, 16  ;;  %v2500_v49 = vmul.f32 %v2407_v24, %v2407_v24  ;;  %v557_v18 = vor.u32 %v556_v5, %v555_v22 }
 0x11b   : > { %v850_v61 = vadd.s32 1, %v846_v55  ;;  %v963_v1 = vmul.u32 %v961_v37, %v958_v53  ;;  %v793_v54 = vsel %vm787_vm6, %v790_v62, %v792_v7  ;;  %v983_v10 = vshrl.u32 %v952_v2, 16 }
 0x11c   : > { %vm849_vm3 = vc.u32 %v2487_v47, %v2495_v25  ;;  %v2506_v44 = vmul.u32 %v960_v19, %v959_v50  ;;  %v703_v46 = vsub.s32 0, %v2479_v35  ;;  %v982_v63 = vand.u32 65535, %v952_v2 }
 0x11d   : > { %v966_v51 = vshll.u32 %v963_v1, 16  ;;  %v274_v4 = vadd.f32 %v1971_v14, %v273_v30  ;;  %v562_v60 = vand.u32 2147483647, %v561_v8  ;;  %vm702_vm4 = vcmp.lt.s32.totalorder %v2479_v35, 0 }
 0x11e   : > { %v962_v12 = vmul.u32 %v960_v19, %v958_v53  ;;  %v425_v33 = vmul.f32 -0.00019511016, %v2500_v49  ;;  %v564_v16 = vcvt.s32.f32 %v557_v18  ;;  %v847_v56 = vmul.u32 %v2318_v0, %v793_v54 }
 0x11f   : > { %v851_v43 = vsel %vm849_vm3, %v850_v61, %v846_v55  ;;  %v968_v45 = vshll.u32 %v2506_v44, 16  ;;  %v985_v26 = vmul.u32 %v983_v10, %v958_v53  ;;  %v704_v39 = vsel %vm702_vm4, %v703_v46, %v2479_v35  ;;  %v276_v61 = vpop.f32.mrf.mxu3 }
 0x120   : > { %vm970_vm5 = vc.u32 %v962_v12, %v966_v51  ;;  %v972_v34 = vadd.s32 %v966_v51, %v962_v12  ;;  %v965_v29 = vmul.u32 %v961_v37, %v959_v50  ;;  %v2516_v22 = vmul.u32 %v982_v63, %v959_v50 }
 0x121   : > { %v971_v14 = vsel %vm970_vm5, 1, %v3272_v27  ;;  %v565_v5 = vmul.f32 %v564_v16, %v562_v60  ;;  %v2518_v38 = vadd.s32 %v851_v43, %v847_v56  ;;  %v988_v62 = vshll.u32 %v985_v26, 16 }
 0x122   : > { %vm974_vm6 = vc.u32 %v972_v34, %v968_v45  ;;  %v973_v7 = vadd.s32 %v971_v14, %v965_v29  ;;  %v984_v0 = vmul.u32 %v982_v63, %v958_v53  ;;  %v418_v55 = vmul.f32 -0.001358992, %v2500_v49 }
 0x123   : > { %v426_v2 = vadd.f32 0.008332121, %v425_v33  ;;  %v705_v19 = vclz %v704_v39  ;;  %v975_v8 = vsel %vm974_vm6, 1, %v3272_v27  ;;  %v987_v30 = vmul.u32 %v983_v10, %v959_v50 }
 0x124   : > { %v990_v37 = vshll.u32 %v2516_v22, 16  ;;  %vm992_vm8 = vc.u32 %v984_v0, %v988_v62  ;;  %v994_v18 = vadd.s32 %v988_v62, %v984_v0  ;;  %v2523_v54 = vmul.f32 30.0, %v274_v4 }
 0x125   : > { %v566_v46 = vxor.u32 2147483648, %v565_v5  ;;  %v853_v51 = vadd.s32 536870912, %v2518_v38  ;;  %v993_v60 = vsel %vm992_vm8, 1, %v3272_v27  ;;  %v413_v53 = vsub.s32 4, %v2145_v9 }
 0x126   : > { %v977_v63 = vadd.s32 %v975_v8, %v973_v7  ;;  %v995_v12 = vadd.s32 %v993_v60, %v987_v30  ;;  %vm996_vm9 = vc.u32 %v994_v18, %v990_v37  ;;  %v419_v33 = vadd.f32 0.041655596, %v418_v55 }
 0x127   : > { %v427_v50 = vmul.f32 %v426_v2, %v2500_v49  ;;  %vm446_vm10 = vcmp.lt.s32.totalorder %v1978_v23, 0  ;;  %v997_v10 = vsel %vm996_vm9, 1, %v3272_v27  ;;  %v1682_v16 = vadd.s32 4294967294, %v705_v19 }
 0x128   : > { %v967_v4 = vshrl.u32 %v963_v1, 16  ;;  %v989_v56 = vshrl.u32 %v985_v26, 16  ;;  %v999_v43 = vadd.s32 %v997_v10, %v995_v12  ;;  %vm2533_vm12 = vcmp.le.f32.partialorder %v444_v41, 0.7853982 }
 0x129   : > { %v567_v34 = vsel %vm446_vm10, %v566_v46, %v565_v5  ;;  %v2539_v39 = vshrl.u32 %v853_v51, 30  ;;  %v1067_v29 = vand.u32 2139095040, %v2523_v54  ;;  %v414_v14 = vsel %vm291_vm11, %v413_v53, %v2145_v9  ;;  %v1796_v5 = vld [vmem:[%s3253_s2] ss:$0 sm:$0xff] }
 0x12a   : > { %v568_v1 = vsub.s32 4, %v2249_v3  ;;  %v978_v26 = vadd.s32 %v977_v63, %v967_v4  ;;  %v1000_v62 = vadd.s32 %v999_v43, %v989_v56  ;;  %v420_v41 = vmul.f32 %v419_v33, %v2500_v49 }
 0x12b   : > { %v428_v7 = vadd.f32 -0.16666654, %v427_v50  ;;  %v991_v0 = vshrl.u32 %v2516_v22, 16  ;;  %v1068_v55 = vshrl.u32 %v1067_v29, 23  ;;  %v277_v2 = vadd.f32 %v1796_v5, %v276_v61 }
 0x12c   : > { %v2554_v19 = vsel %vm2533_vm12, %v1978_v23, %v567_v34  ;;  %vm1683_vm11 = vcmp.lt.s32.totalorder %v1682_v16, 0  ;;  %v969_v9 = vshrl.u32 %v2506_v44, 16  ;;  %v855_v8 = vshll.u32 %v2539_v39, 30  ;;  %v278_v44 = vpop.f32.mrf.mxu3 }
 0x12d   : > { %v946_v22 = vsel %vm944_vm0, %v2437_v57, 2102212464  ;;  %v1001_v30 = vadd.s32 %v1000_v62, %v991_v0  ;;  %v1690_v46 = vadd.s32 4294967169, %v1068_v55  ;;  %v416_v51 = vsel %vm2392_vm13, 0, %v414_v14 }
 0x12e   : > { %v569_v61 = vsel %vm446_vm10, %v568_v1, %v2249_v3  ;;  %v925_v60 = vshrl.u32 %v3270_v32, %v2388_v11  ;;  %v2568_v53 = vadd.s32 %v978_v26, %v969_v9  ;;  %v421_v63 = vadd.f32 -0.4999988, %v420_v41 }
 0x12f   : > { %v429_v12 = vmul.f32 %v428_v7, %v2500_v49  ;;  %v2573_v57 = vmul.f32 %v2554_v19, %v2554_v19  ;;  %v1074_v33 = vadd.s32 1, %v1690_v46  ;;  %v2575_v58 = vsel %vm1683_vm11, 0, %v1682_v16 }
 0x130   : > { %v945_v3 = vsel %vm941_vm1, %v925_v60, %v2442_v21  ;;  %v947_v11 = vsel %vm943_vm2, %v2435_v52, %v946_v22  ;;  %v2583_v50 = vadd.s32 %v994_v18, %v990_v37  ;;  %v571_v10 = vsel %vm2533_vm12, 0, %v569_v61 }
 0x131   : > { %v2588_v4 = vsub.s32 %v2518_v38, %v855_v8  ;;  %v1005_v56 = vadd.s32 1, %v1001_v30  ;;  %vm1075_vm13 = vcmp.gt.s32.totalorder %v1074_v33, 0  ;;  %v279_v16 = vadd.f32 %v1796_v5, %v278_v44 }
 0x132   : > { %v2590_v43 = vmul.f32 30.0, %v277_v2  ;;  %vm1004_vm14 = vc.u32 %v2568_v53, %v2583_v50  ;;  %v1076_v21 = vsel %vm1075_vm13, %v1074_v33, 0  ;;  %v433_v34 = vadd.s32 3, %v416_v51 }
 0x133   : > { %v713_v52 = vsub.s32 4294967266, %v2575_v58  ;;  %v948_v37 = vsel %vm942_vm7, %v945_v3, %v947_v11  ;;  %v1078_v18 = vand.u32 31, %v1076_v21  ;;  %v422_v45 = vmul.f32 %v421_v63, %v2500_v49 }
 0x134   : > { %3301 = vst [vmem:[#allocation8_spill] sm:$0xff] %v2590_v43  ;;  %v430_v38 = vadd.f32 1.0, %v429_v12  ;;  %v573_v29 = vmul.f32 -0.001358992, %v2573_v57  ;;  %v588_v14 = vadd.s32 3, %v571_v10  ;;  %v709_v26 = vsub.s32 32, %v2575_v58 }
 0x135   : > { %v580_v1 = vmul.f32 -0.00019511016, %v2573_v57  ;;  %v858_v62 = vsub.s32 0, %v2588_v4  ;;  %v1006_v41 = vsel %vm1004_vm14, %v1005_v56, %v1001_v30  ;;  %vm857_vm15 = vcmp.lt.s32.totalorder %v2588_v4, 0 }
 0x136   : > { %v1002_v7 = vmul.u32 %v2463_v6, %v948_v37  ;;  %v3262_v31 = vand.u32 2147483647, %v2523_v54  ;;  %v1222_v0 = vand.u32 2139095040, %v2590_v43  ;;  %v2606_v49 = vmul.f32 30.0, %v279_v16 }
 0x137   : > { %v2608_v55 = vand.u32 3, %v433_v34  ;;  %v714_v5 = vadd.s32 127, %v713_v52  ;;  %v2610_v2 = vsub.s32 32, %v1078_v18  ;;  %v2612_v9 = vadd.f32 1.0, %v422_v45 }
 0x138   : > { %3302 = vst [vmem:[#allocation9_spill] sm:$0xff] %v2606_v49  ;;  %v2614_v8 = vand.u32 3, %v588_v14  ;;  %v693_v22 = vadd.s32 %v2357_v20, %v2334_v42  ;;  %v1007_v30 = vadd.s32 %v1006_v41, %v1002_v7  ;;  %v2619_v6 = vmul.f32 %v430_v38, %v2407_v24 }
 0x139   : > { %v574_v46 = vadd.f32 0.041655596, %v573_v29  ;;  %v581_v51 = vadd.f32 0.008332121, %v580_v1  ;;  %v859_v61 = vsel %vm857_vm15, %v858_v62, %v2588_v4  ;;  %v710_v60 = vshll.u32 %v2479_v35, %v2575_v58 }
 0x13a   : > { %v711_v44 = vshrl.u32 %v693_v22, %v709_v26  ;;  %v1071_v63 = vand.u32 8388607, %v3262_v31  ;;  %v1223_v12 = vshrl.u32 %v1222_v0, 23  ;;  %v715_v33 = vshll.u32 %v714_v5, 23 }
 0x13b   : > { %v3303_v3 = vmov 2475754826   ;;  %v1085_v20 = vshrl.u32 %v3268_v36, %v2610_v2  ;;  %v1091_v24 = vshrl.u32 %v3265_v40, %v2610_v2  ;;  %v860_v11 = vclz %v859_v61 }
 0x13c   : > { %v1082_v42 = vshrl.u32 %v3303_v3, %v2610_v2  ;;  %v1008_v10 = vadd.s32 536870912, %v1007_v30  ;;  %v1081_v56 = vshll.u32 %v3270_v32, %v1078_v18  ;;  %v3304_v35 = vmov 2102212464  }
 0x13d   : > { %v1088_v58 = vshrl.u32 %v3304_v35, %v2610_v2  ;;  %v1084_v16 = vshll.u32 %v3303_v3, %v1078_v18  ;;  %v1090_v34 = vshll.u32 %v3304_v35, %v1078_v18  ;;  %v1093_v52 = vshll.u32 %v3265_v40, %v1078_v18 }
 0x13e   : > { %v1094_v37 = vshrl.u32 %v3263_v48, %v2610_v2  ;;  %v1072_v45 = vor.u32 8388608, %v1071_v63  ;;  %v2640_v38 = vshrl.u32 %v1076_v21, 5  ;;  %v1087_v29 = vshll.u32 %v3268_v36, %v1078_v18 }
 0x13f   : > { %v1693_v14 = vadd.s32 4294967169, %v1223_v12  ;;  %v2643_v1 = vor.u32 %v1082_v42, %v1081_v56  ;;  %v2645_v26 = vor.u32 %v1085_v20, %v1084_v16  ;;  %v1092_v62 = vor.u32 %v1091_v24, %v1090_v34 }
 0x140   : > { %v1095_v41 = vor.u32 %v1094_v37, %v1093_v52  ;;  %v575_v0 = vmul.f32 %v574_v46, %v2573_v57  ;;  %v2649_v5 = vshrl.u32 %v1008_v10, 30  ;;  %v1089_v22 = vor.u32 %v1088_v58, %v1087_v29 }
 0x141   : > { %v582_v21 = vmul.f32 %v581_v51, %v2573_v57  ;;  %v712_v63 = vor.u32 %v711_v44, %v710_v60  ;;  %v716_v18 = vor.u32 4788187, %v715_v33  ;;  %v1685_v12 = vadd.s32 4294967294, %v860_v11 }
 0x142   : > { %3305 = vst [vmem:[#allocation10_spill] sm:$0xff] %v2649_v5  ;;  %vm1096_vm0 = vcmp.lt.s32.totalorder %v2640_v38, 1  ;;  %vm1099_vm1 = vcmp.lt.s32.totalorder %v2640_v38, 4  ;;  %v2655_v42 = vshll.u32 %v1072_v45, 8  ;;  %v1229_v60 = vadd.s32 1, %v1693_v14 }
 0x143   : > { %v1104_v46 = vsel %vm1096_vm0, %v2643_v1, %v2645_v26  ;;  %v1105_v20 = vsel %vm1099_vm1, %v1092_v62, 920167782  ;;  %v1109_v51 = vsel %vm1099_vm1, %v1095_v41, 1326507024  ;;  %v2665_v44 = vadd.f32 -0.4999988, %v575_v0 }
 0x144   : > { %v1010_v33 = vshll.u32 %v2649_v5, 30  ;;  %vm1098_vm2 = vcmp.lt.s32.totalorder %v2640_v38, 3  ;;  %v1108_v24 = vsel %vm1096_vm0, %v2645_v26, %v1089_v22  ;;  %v717_v11 = vand.u32 2147483647, %v716_v18 }
 0x145   : > { %vm1097_vm7 = vcmp.lt.s32.totalorder %v2640_v38, 2  ;;  %v1106_v10 = vsel %vm1098_vm2, %v1089_v22, %v1105_v20  ;;  %v1110_v56 = vsel %vm1098_vm2, %v1092_v62, %v1109_v51  ;;  %v719_v58 = vcvt.s32.f32 %v712_v63 }
 0x146   : > { %vm1686_vm3 = vcmp.lt.s32.totalorder %v1685_v12, 0  ;;  %v1107_v16 = vsel %vm1097_vm7, %v1104_v46, %v1106_v10  ;;  %v1113_v34 = vand.u32 65535, %v2655_v42  ;;  %v1111_v52 = vsel %vm1097_vm7, %v1108_v24, %v1110_v56 }
 0x147   : > { %v1137_v37 = vand.u32 65535, %v1107_v16  ;;  %v1138_v45 = vshrl.u32 %v1107_v16, 16  ;;  %vm1230_vm4 = vcmp.gt.s32.totalorder %v1229_v60, 0  ;;  %v2682_v29 = vadd.f32 -0.16666654, %v582_v21 }
 0x148   : > { %v2684_v14 = vsub.s32 %v1007_v30, %v1010_v33  ;;  %v1115_v41 = vand.u32 65535, %v1111_v52  ;;  %v1116_v0 = vshrl.u32 %v1111_v52, 16  ;;  %v2686_v62 = vmul.f32 %v719_v58, %v717_v11 }
 0x149   : > { %v2688_v63 = vsel %vm1686_vm3, 0, %v1685_v12  ;;  %v1114_v18 = vshrl.u32 %v2655_v42, 16  ;;  %v1140_v46 = vmul.u32 %v1138_v45, %v1113_v34  ;;  %v1080_v20 = vshrl.u32 %v3270_v32, %v2610_v2 }
 0x14a   : > { %v1118_v51 = vmul.u32 %v1116_v0, %v1113_v34  ;;  %v3267_v24 = vand.u32 2147483647, %v2590_v43  ;;  %v1231_v10 = vsel %vm1230_vm4, %v1229_v60, 0  ;;  %v1139_v56 = vmul.u32 %v1137_v37, %v1113_v34 }
 0x14b   : > { %v1119_v21 = vmul.u32 %v1115_v41, %v1114_v18  ;;  %v1141_v30 = vmul.u32 %v1137_v37, %v1114_v18  ;;  %v1143_v33 = vshll.u32 %v1140_v46, 16  ;;  %vm1012_vm5 = vcmp.lt.s32.totalorder %v2684_v14, 0 }
 0x14c   : > { %v1013_v11 = vsub.s32 0, %v2684_v14  ;;  %v1117_v12 = vmul.u32 %v1115_v41, %v1113_v34  ;;  %v1121_v58 = vshll.u32 %v1118_v51, 16  ;;  %v1101_v16 = vsel %vm1099_vm1, %v1089_v22, 2102212464 }
 0x14d   : > { %v1120_v52 = vmul.u32 %v1116_v0, %v1114_v18  ;;  %v1142_v31 = vmul.u32 %v1138_v45, %v1114_v18  ;;  %vm1147_vm6 = vc.u32 %v1139_v56, %v1143_v33  ;;  %v1123_v2 = vshll.u32 %v1119_v21, 16 }
 0x14e   : > { %vm1125_vm8 = vc.u32 %v1117_v12, %v1121_v58  ;;  %v1127_v7 = vadd.s32 %v1121_v58, %v1117_v12  ;;  %v1148_v60 = vsel %vm1147_vm6, 1, %v3272_v27  ;;  %v1145_v61 = vshll.u32 %v1141_v30, 16 }
 0x14f   : > { %v1126_v37 = vsel %vm1125_vm8, 1, %v3272_v27  ;;  %v1149_v48 = vadd.s32 %v1143_v33, %v1139_v56  ;;  %v1150_v40 = vadd.s32 %v1148_v60, %v1142_v31  ;;  %v1014_v34 = vsel %vm1012_vm5, %v1013_v11, %v2684_v14 }
 0x150   : > { %v1128_v41 = vadd.s32 %v1126_v37, %v1120_v52  ;;  %vm1129_vm9 = vc.u32 %v1127_v7, %v1123_v2  ;;  %v1233_v22 = vand.u32 31, %v1231_v10  ;;  %v1100_v45 = vsel %vm1096_vm0, %v1080_v20, %v2643_v1 }
 0x151   : > { %v1102_v0 = vsel %vm1098_vm2, %v2645_v26, %v1101_v16  ;;  %v1130_v18 = vsel %vm1129_vm9, 1, %v3272_v27  ;;  %vm1151_vm10 = vc.u32 %v1149_v48, %v1145_v61  ;;  %v1122_v56 = vshrl.u32 %v1118_v51, 16 }
 0x152   : > { %v1132_v31 = vadd.s32 %v1130_v18, %v1128_v41  ;;  %v1152_v33 = vsel %vm1151_vm10, 1, %v3272_v27  ;;  %v2711_v12 = vsub.s32 32, %v1233_v22  ;;  %vm601_vm12 = vcmp.lt.s32.totalorder %v2071_v59, 0 }
 0x153   : > { %v721_v7 = vxor.u32 2147483648, %v2686_v62  ;;  %v864_v11 = vsub.s32 32, %v2688_v63  ;;  %v1144_v1 = vshrl.u32 %v1140_v46, 16  ;;  %v1154_v20 = vadd.s32 %v1152_v33, %v1150_v40 }
 0x154   : > { %v868_v58 = vsub.s32 4294967266, %v2688_v63  ;;  %v1124_v26 = vshrl.u32 %v1119_v21, 16  ;;  %v1133_v16 = vadd.s32 %v1132_v31, %v1122_v56  ;;  %v1226_v51 = vand.u32 8388607, %v3267_v24 }
 0x155   : > { %v1015_v52 = vclz %v1014_v34  ;;  %v1103_v2 = vsel %vm1097_vm7, %v1100_v45, %v1102_v0  ;;  %v1146_v60 = vshrl.u32 %v1141_v30, 16  ;;  %v1155_v37 = vadd.s32 %v1154_v20, %v1144_v1 }
 0x156   : > { %v3306_v41 = vand.u32 2147483647, %v2071_v59  ;;  %v2727_v40 = vadd.s32 %v1133_v16, %v1124_v26  ;;  %v2729_v46 = vadd.s32 %v1149_v48, %v1145_v61  ;;  %v1237_v21 = vshrl.u32 %v3303_v3, %v2711_v12 }
 0x157   : > { %v1240_v34 = vshrl.u32 %v3268_v36, %v2711_v12  ;;  %v1156_v38 = vadd.s32 %v1155_v37, %v1146_v60  ;;  %v2735_v45 = vshrl.u32 %v1231_v10, 5  ;;  %v1236_v30 = vshll.u32 %v3270_v32, %v1233_v22 }
 0x158   : > { %vm2723_vm11 = vcmp.le.f32.partialorder %v3306_v41, 0.7853982  ;;  %v1243_v0 = vshrl.u32 %v3304_v35, %v2711_v12  ;;  %vm1159_vm13 = vc.u32 %v2727_v40, %v2729_v46  ;;  %v1239_v48 = vshll.u32 %v3303_v3, %v1233_v22 }
 0x159   : > { %v1242_v61 = vshll.u32 %v3268_v36, %v1233_v22  ;;  %v1245_v56 = vshll.u32 %v3304_v35, %v1233_v22  ;;  %v1160_v31 = vadd.s32 1, %v1156_v38  ;;  %v3309_v33 = vmov 920167782  }
 0x15a   : > { %v1246_v1 = vshrl.u32 %v3309_v33, %v2711_v12  ;;  %v1248_v10 = vshll.u32 %v3309_v33, %v1233_v22  ;;  %v3310_v20 = vmov 1326507024   ;;  %v1688_v16 = vadd.s32 4294967294, %v1015_v52 }
 0x15b   : > { %v1249_v26 = vshrl.u32 %v3310_v20, %v2711_v12  ;;  %v1157_v60 = vmul.u32 %v2655_v42, %v1103_v2  ;;  %v2751_v37 = vor.u32 %v1237_v21, %v1236_v30  ;;  %v2753_v41 = vor.u32 %v1240_v34, %v1239_v48 }
 0x15c   : > { %v1161_v24 = vsel %vm1159_vm13, %v1160_v31, %v1156_v38  ;;  %v2755_v36 = vor.u32 %v1243_v0, %v1242_v61  ;;  %v1247_v32 = vor.u32 %v1246_v1, %v1245_v56  ;;  %v722_v17 = vsel %vm601_vm12, %v721_v7, %v2686_v62 }
 0x15d   : > { %v1250_v27 = vor.u32 %v1249_v26, %v1248_v10  ;;  %v1162_v22 = vadd.s32 %v1161_v24, %v1157_v60  ;;  %v1227_v23 = vor.u32 8388608, %v1226_v51  ;;  %vm1254_vm14 = vcmp.lt.s32.totalorder %v2735_v45, 4 }
 0x15e   : > { %v848_v42 = vadd.s32 %v2495_v25, %v2487_v47  ;;  %v869_v52 = vadd.s32 127, %v868_v58  ;;  %vm1251_vm15 = vcmp.lt.s32.totalorder %v2735_v45, 1  ;;  %v1260_v2 = vsel %vm1254_vm14, %v1247_v32, 920167782 }
 0x15f   : > { %vm1689_vm0 = vcmp.lt.s32.totalorder %v1688_v16, 0  ;;  %v1163_v21 = vadd.s32 536870912, %v1162_v22  ;;  %vm1253_vm1 = vcmp.lt.s32.totalorder %v2735_v45, 3  ;;  %v1259_v62 = vsel %vm1251_vm15, %v2751_v37, %v2753_v41 }
 0x160   : > { %v2774_v24 = vsel %vm2723_vm11, %v2071_v59, %v722_v17  ;;  %v866_v47 = vshrl.u32 %v848_v42, %v864_v11  ;;  %v1261_v25 = vsel %vm1253_vm1, %v2755_v36, %v1260_v2  ;;  %v1264_v7 = vsel %vm1254_vm14, %v1250_v27, 1326507024 }
 0x161   : > { %3311 = vst [vmem:[#allocation11_spill] sm:$0xff] %v2774_v24  ;;  %v2781_v58 = vshrl.u32 %v1163_v21, 30  ;;  %vm1252_vm2 = vcmp.lt.s32.totalorder %v2735_v45, 2  ;;  %v1263_v51 = vsel %vm1251_vm15, %v2753_v41, %v2755_v36  ;;  %v2788_v34 = vshll.u32 %v1227_v23, 8 }
 0x162   : > { %v865_v17 = vshll.u32 %v2588_v4, %v2688_v63  ;;  %v2792_v11 = vsel %vm1689_vm0, 0, %v1688_v16  ;;  %v1262_v38 = vsel %vm1252_vm2, %v1259_v62, %v1261_v25  ;;  %v1265_v27 = vsel %vm1253_vm1, %v1247_v32, %v1264_v7 }
 0x163   : > { %3312 = vst [vmem:[#allocation12_spill] sm:$0xff] %v2781_v58  ;;  %v2800_v30 = vmul.f32 %v2665_v44, %v2573_v57  ;;  %v723_v0 = vsub.s32 4, %v2419_v28  ;;  %v870_v48 = vshll.u32 %v869_v52, 23  ;;  %v1165_v23 = vshll.u32 %v2781_v58, 30 }
 0x164   : > { %v2806_v4 = vmul.f32 %v2682_v29, %v2573_v57  ;;  %v2810_v63 = vmul.f32 %v2774_v24, %v2774_v24  ;;  %v867_v61 = vor.u32 %v866_v47, %v865_v17  ;;  %v1266_v32 = vsel %vm1252_vm2, %v1263_v51, %v1265_v27 }
 0x165   : > { %v1023_v44 = vsub.s32 4294967266, %v2792_v11  ;;  %v2815_v56 = vsub.s32 %v1162_v22, %v1165_v23  ;;  %v1268_v31 = vand.u32 65535, %v2788_v34  ;;  %v1293_v1 = vshrl.u32 %v1262_v38, 16 }
 0x166   : > { %v1269_v10 = vshrl.u32 %v2788_v34, 16  ;;  %v1270_v26 = vand.u32 65535, %v1266_v32  ;;  %v1271_v57 = vshrl.u32 %v1266_v32, 16  ;;  %v1292_v29 = vand.u32 65535, %v1262_v38 }
 0x167   : > { %v871_v16 = vor.u32 4788187, %v870_v48  ;;  %v1019_v60 = vsub.s32 32, %v2792_v11  ;;  %vm1167_vm7 = vcmp.lt.s32.totalorder %v2815_v56, 0  ;;  %v1168_v42 = vsub.s32 0, %v2815_v56 }
 0x168   : > { %v2825_v22 = vsel %vm601_vm12, %v723_v0, %v2419_v28  ;;  %v2828_v52 = vmul.f32 -0.001358992, %v2810_v63  ;;  %v1273_v2 = vmul.u32 %v1271_v57, %v1268_v31  ;;  %v1274_v21 = vmul.u32 %v1270_v26, %v1269_v10 }
 0x169   : > { %v1003_v62 = vadd.s32 %v2583_v50, %v2568_v53  ;;  %v1024_v47 = vadd.s32 127, %v1023_v44  ;;  %v1169_v25 = vsel %vm1167_vm7, %v1168_v42, %v2815_v56  ;;  %v1295_v7 = vmul.u32 %v1293_v1, %v1268_v31 }
 0x16a   : > { %v1170_v51 = vclz %v1169_v25  ;;  %v1272_v17 = vmul.u32 %v1270_v26, %v1268_v31  ;;  %v1276_v38 = vshll.u32 %v1273_v2, 16  ;;  %v1296_v27 = vmul.u32 %v1292_v29, %v1269_v10 }
 0x16b   : > { %v872_v48 = vand.u32 2147483647, %v871_v16  ;;  %v874_v23 = vcvt.s32.f32 %v867_v61  ;;  %v1021_v28 = vshrl.u32 %v1003_v62, %v1019_v60  ;;  %v1275_v0 = vmul.u32 %v1271_v57, %v1269_v10 }
 0x16c   : > { %v1691_v32 = vadd.s32 4294967294, %v1170_v51  ;;  %v1278_v59 = vshll.u32 %v1274_v21, 16  ;;  %vm1280_vm3 = vc.u32 %v1272_v17, %v1276_v38  ;;  %v1282_v43 = vadd.s32 %v1276_v38, %v1272_v17 }
 0x16d   : > { %v1025_v24 = vshll.u32 %v1024_v47, 23  ;;  %v3313_v58 = vmov 0   ;;  %v1294_v53 = vmul.u32 %v1292_v29, %v1268_v31  ;;  %v1298_v50 = vshll.u32 %v1295_v7, 16 }
 0x16e   : > { %v1281_v5 = vsel %vm1280_vm3, 1, %v3313_v58  ;;  %vm1692_vm4 = vcmp.lt.s32.totalorder %v1691_v32, 0  ;;  %vm1284_vm5 = vc.u32 %v1282_v43, %v1278_v59  ;;  %v1300_v42 = vshll.u32 %v1296_v27, 16 }
 0x16f   : > { %v1283_v44 = vadd.s32 %v1281_v5, %v1275_v0  ;;  %v1173_v26 = vsel %vm1692_vm4, 0, %v1691_v32  ;;  %v1285_v25 = vsel %vm1284_vm5, 1, %v3313_v58  ;;  %vm1302_vm6 = vc.u32 %v1294_v53, %v1298_v50 }
 0x170   : > { %v1304_v61 = vadd.s32 %v1298_v50, %v1294_v53  ;;  %v1178_v16 = vsub.s32 4294967266, %v1173_v26  ;;  %v1277_v57 = vshrl.u32 %v1273_v2, 16  ;;  %v1297_v62 = vmul.u32 %v1293_v1, %v1269_v10 }
 0x171   : > { %v1287_v60 = vadd.s32 %v1285_v25, %v1283_v44  ;;  %v875_v51 = vmul.f32 %v874_v23, %v872_v48  ;;  %v1020_v47 = vshll.u32 %v2684_v14, %v2792_v11  ;;  %v1303_v31 = vsel %vm1302_vm6, 1, %v3313_v58 }
 0x172   : > { %vm1306_vm8 = vc.u32 %v1304_v61, %v1300_v42  ;;  %vm756_vm9 = vcmp.lt.s32.totalorder %v2237_v15, 0  ;;  %v1179_v59 = vadd.s32 127, %v1178_v16  ;;  %v1256_v43 = vsel %vm1254_vm14, %v2755_v36, 2102212464 }
 0x173   : > { %v1288_v5 = vadd.s32 %v1287_v60, %v1277_v57  ;;  %v1305_v29 = vadd.s32 %v1303_v31, %v1297_v62  ;;  %v1026_v17 = vor.u32 4788187, %v1025_v24  ;;  %v3314_v2 = vmov 683565275  }
 0x174   : > { %v1235_v1 = vshrl.u32 %v3314_v2, %v2711_v12  ;;  %v1279_v10 = vshrl.u32 %v1274_v21, 16  ;;  %v1307_v38 = vsel %vm1306_vm8, 1, %v3313_v58  ;;  %vm436_vm10 = vcmp.eq.s32.totalorder %v2608_v55, 0 }
 0x175   : > { %v1022_v14 = vor.u32 %v1021_v28, %v1020_v47  ;;  %v1174_v11 = vsub.s32 32, %v1173_v26  ;;  %v1299_v48 = vshrl.u32 %v1295_v7, 16  ;;  %v1309_v23 = vadd.s32 %v1307_v38, %v1305_v29 }
 0x176   : > { %v3315_v0 = vand.u32 2147483647, %v2237_v15  ;;  %v1255_v36 = vsel %vm1251_vm15, %v1235_v1, %v2751_v37  ;;  %v1257_v12 = vsel %vm1253_vm1, %v2753_v41, %v1256_v43  ;;  %v2858_v24 = vadd.s32 %v1288_v5, %v1279_v10 }
 0x177   : > { %v1377_v21 = vand.u32 2139095040, %v2606_v49  ;;  %v1158_v7 = vadd.s32 %v2729_v46, %v2727_v40  ;;  %v1180_v28 = vshll.u32 %v1179_v59, 23  ;;  %v1301_v53 = vshrl.u32 %v1296_v27, 16 }
 0x178   : > { %vm2848_vm12 = vcmp.le.f32.partialorder %v3315_v0, 0.7853982  ;;  %v1310_v50 = vadd.s32 %v1309_v23, %v1299_v48  ;;  %v876_v44 = vxor.u32 2147483648, %v875_v51  ;;  %v1027_v25 = vand.u32 2147483647, %v1026_v17 }
 0x179   : > { %v2863_v16 = vadd.s32 %v1304_v61, %v1300_v42  ;;  %v1378_v57 = vshrl.u32 %v1377_v21, 23  ;;  %vm439_vm13 = vcmp.eq.s32.totalorder %v2608_v55, 2  ;;  %v735_v37 = vmul.f32 -0.00019511016, %v2810_v63 }
 0x17a   : > { %v1176_v41 = vshrl.u32 %v1158_v7, %v1174_v11  ;;  %v1258_v60 = vsel %vm1252_vm2, %v1255_v36, %v1257_v12  ;;  %v1311_v62 = vadd.s32 %v1310_v50, %v1301_v53  ;;  %vm435_vm14 = vcmp.lt.s32.totalorder %v2608_v55, 2 }
 0x17b   : > { %v729_v40 = vadd.f32 0.041655596, %v2828_v52  ;;  %v1029_v46 = vcvt.s32.f32 %v1022_v14  ;;  %vm1314_vm15 = vc.u32 %v2858_v24, %v2863_v16  ;;  %v1696_v27 = vadd.s32 4294967169, %v1378_v57 }
 0x17c   : > { %v585_v42 = vadd.f32 1.0, %v2806_v4  ;;  %v1175_v61 = vshll.u32 %v2815_v56, %v1173_v26  ;;  %v1181_v47 = vor.u32 4788187, %v1180_v28  ;;  %v1315_v31 = vadd.s32 1, %v1311_v62 }
 0x17d   : > { %v877_v45 = vsel %vm756_vm9, %v876_v44, %v875_v51  ;;  %v1030_v59 = vmul.f32 %v1029_v46, %v1027_v25  ;;  %v1312_v43 = vmul.u32 %v2788_v34, %v1258_v60  ;;  %v1384_v5 = vadd.s32 1, %v1696_v27 }
 0x17e   : > { %v726_v52 = vsel %vm2723_vm11, 0, %v2825_v22  ;;  %v736_v29 = vadd.f32 0.008332121, %v735_v37  ;;  %v1177_v17 = vor.u32 %v1176_v41, %v1175_v61  ;;  %v1316_v1 = vsel %vm1314_vm15, %v1315_v31, %v1311_v62 }
 0x17f   : > { %v3318_v4 = vxor.u32 2147483648, %v2619_v6  ;;  %v730_v26 = vmul.f32 %v729_v40, %v2810_v63  ;;  %v1317_v51 = vadd.s32 %v1316_v1, %v1312_v43  ;;  %vm1385_vm0 = vcmp.gt.s32.totalorder %v1384_v5, 0 }
 0x180   : > { %v2888_v34 = vadd.f32 1.0, %v2800_v30  ;;  %v2893_v18 = vsel %vm2848_vm12, %v2237_v15, %v877_v45  ;;  %v1182_v22 = vand.u32 2147483647, %v1181_v47  ;;  %v1386_v10 = vsel %vm1385_vm0, %v1384_v5, 0 }
 0x181   : > { %v438_v56 = vsel %vm436_vm10, %v2612_v9, %v3318_v4  ;;  %v743_v38 = vadd.s32 3, %v726_v52  ;;  %v1031_v14 = vxor.u32 2147483648, %v1030_v59  ;;  %v1318_v11 = vadd.s32 536870912, %v1317_v51 }
 0x182   : > { %v1388_v48 = vand.u32 31, %v1386_v10  ;;  %v2896_v23 = vmul.f32 %v585_v42, %v2554_v19  ;;  %v737_v0 = vmul.f32 %v736_v29, %v2810_v63  ;;  %v1184_v36 = vcvt.s32.f32 %v1177_v17 }
 0x183   : > { %v3287_v30 = vand.u32 2147483647, %v2606_v49  ;;  %v3319_v12 = vxor.u32 2147483648, %v2612_v9  ;;  %v731_v7 = vadd.f32 -0.4999988, %v730_v26  ;;  %v2907_v28 = vmul.f32 %v2893_v18, %v2893_v18 }
 0x184   : > { %v2909_v53 = vshrl.u32 %v1318_v11, 30  ;;  %vm911_vm11 = vcmp.lt.s32.totalorder %v2259_v13, 0  ;;  %v1185_v50 = vmul.f32 %v1184_v36, %v1182_v22  ;;  %v2916_v44 = vsub.s32 32, %v1388_v48 }
 0x185   : > { %v441_v21 = vsel %vm439_vm13, %v3319_v12, %v2619_v6  ;;  %vm594_vm1 = vcmp.eq.s32.totalorder %v2614_v8, 2  ;;  %v595_v9 = vxor.u32 2147483648, %v2888_v34  ;;  %v3322_v6 = vand.u32 2147483647, %v2259_v13 }
 0x186   : > { %3320 = vst [vmem:[#allocation13_spill] sm:$0xff] %v2909_v53  ;;  %v2913_v19 = vsel %vm435_vm14, %v438_v56, %v441_v21  ;;  %v1032_v55 = vsel %vm911_vm11, %v1031_v14, %v1030_v59  ;;  %v1320_v57 = vshll.u32 %v2909_v53, 30  ;;  %v738_v41 = vadd.f32 -0.16666654, %v737_v0 }
 0x187   : > { %3321 = vst [vmem:[#allocation14_spill] sm:$0xff] %v2913_v19  ;;  %vm2922_vm2 = vcmp.le.f32.partialorder %v3322_v6, 0.7853982  ;;  %v2930_v60 = vand.u32 3, %v743_v38  ;;  %v1381_v62 = vand.u32 8388607, %v3287_v30  ;;  %v732_v40 = vmul.f32 %v731_v7, %v2810_v63 }
 0x188   : > { %v890_v46 = vmul.f32 -0.00019511016, %v2907_v28  ;;  %vm1066_vm7 = vcmp.lt.s32.totalorder %v2523_v54, 0  ;;  %v2937_v27 = vsub.s32 %v1317_v51, %v1320_v57  ;;  %v2942_v42 = vsel %vm2922_vm2, %v2259_v13, %v1032_v55 }
 0x189   : > { %v1186_v61 = vxor.u32 2147483648, %v1185_v50  ;;  %v1392_v47 = vshrl.u32 %v3303_v3, %v2916_v44  ;;  %v3325_v31 = vmov 2131351028   ;;  %v1398_v43 = vshrl.u32 %v3304_v35, %v2916_v44 }
 0x18a   : > { %v1395_v45 = vshrl.u32 %v3325_v31, %v2916_v44  ;;  %vm1322_vm3 = vcmp.lt.s32.totalorder %v2937_v27, 0  ;;  %v1323_v59 = vsub.s32 0, %v2937_v27  ;;  %v1401_v5 = vshrl.u32 %v3309_v33, %v2916_v44 }
 0x18b   : > { %v1382_v52 = vor.u32 8388608, %v1381_v62  ;;  %v1391_v29 = vshll.u32 %v3314_v2, %v1388_v48  ;;  %v1394_v17 = vshll.u32 %v3303_v3, %v1388_v48  ;;  %v1397_v1 = vshll.u32 %v3325_v31, %v1388_v48 }
 0x18c   : > { %v1324_v4 = vsel %vm1322_vm3, %v1323_v59, %v2937_v27  ;;  %v1400_v56 = vshll.u32 %v3304_v35, %v1388_v48  ;;  %v1403_v26 = vshll.u32 %v3309_v33, %v1388_v48  ;;  %v1404_v51 = vshrl.u32 %v3310_v20, %v2916_v44 }
 0x18d   : > { %v1187_v22 = vsel %vm1066_vm7, %v1186_v61, %v1185_v50  ;;  %v1325_v38 = vclz %v1324_v4  ;;  %v2964_v14 = vshrl.u32 %v1386_v10, 5  ;;  %v2966_v11 = vor.u32 %v1392_v47, %v1391_v29 }
 0x18e   : > { %v2968_v3 = vor.u32 %v1395_v45, %v1394_v17  ;;  %v2970_v0 = vor.u32 %v1398_v43, %v1397_v1  ;;  %v1402_v36 = vor.u32 %v1401_v5, %v1400_v56  ;;  %v1405_v12 = vor.u32 %v1404_v51, %v1403_v26 }
 0x18f   : > { %v2975_v35 = vsel %vm594_vm1, %v595_v9, %v2896_v23  ;;  %v739_v33 = vmul.f32 %v738_v41, %v2810_v63  ;;  %v3326_v20 = vand.u32 2147483647, %v2523_v54  ;;  %v1694_v48 = vadd.s32 4294967294, %v1325_v38 }
 0x190   : > { %v2984_v21 = vadd.f32 1.0, %v732_v40  ;;  %v891_v7 = vadd.f32 0.008332121, %v890_v46  ;;  %v2988_v50 = vmul.f32 %v2942_v42, %v2942_v42  ;;  %vm1406_vm6 = vcmp.lt.s32.totalorder %v2964_v14, 1 }
 0x191   : > { %vm2980_vm4 = vcmp.le.f32.partialorder %v3326_v20, 0.7853982  ;;  %vm1695_vm5 = vcmp.lt.s32.totalorder %v1694_v48, 0  ;;  %vm1409_vm8 = vcmp.lt.s32.totalorder %v2964_v14, 4  ;;  %v2997_v63 = vshll.u32 %v1382_v52, 8 }
 0x192   : > { %v2993_v9 = vsel %vm2980_vm4, %v2523_v54, %v1187_v22  ;;  %v1414_v6 = vsel %vm1406_vm6, %v2966_v11, %v2968_v3  ;;  %v1415_v55 = vsel %vm1409_vm8, %v1402_v36, 920167782  ;;  %v1418_v57 = vsel %vm1406_vm6, %v2968_v3, %v2970_v0 }
 0x193   : > { %v1419_v41 = vsel %vm1409_vm8, %v1405_v12, 1326507024  ;;  %v883_v62 = vmul.f32 -0.001358992, %v2907_v28  ;;  %v3014_v40 = vmul.f32 %v2993_v9, %v2993_v9  ;;  %v3016_v46 = vsel %vm1695_vm5, 0, %v1694_v48 }
 0x194   : > { %vm1408_vm10 = vcmp.lt.s32.totalorder %v2964_v14, 3  ;;  %v892_v61 = vmul.f32 %v891_v7, %v2907_v28  ;;  %vm1407_vm13 = vcmp.lt.s32.totalorder %v2964_v14, 2  ;;  %v1045_v45 = vmul.f32 -0.00019511016, %v2988_v50 }
 0x195   : > { %v1416_v47 = vsel %vm1408_vm10, %v2970_v0, %v1415_v55  ;;  %v1420_v31 = vsel %vm1408_vm10, %v1402_v36, %v1419_v41  ;;  %v1423_v5 = vand.u32 65535, %v2997_v63  ;;  %v1333_v52 = vsub.s32 4294967266, %v3016_v46 }
 0x196   : > { %v1417_v59 = vsel %vm1407_vm13, %v1414_v6, %v1416_v47  ;;  %v1421_v43 = vsel %vm1407_vm13, %v1418_v57, %v1420_v31  ;;  %v1424_v29 = vshrl.u32 %v2997_v63, 16  ;;  %v3034_v4 = vadd.f32 1.0, %v739_v33 }
 0x197   : > { %v1425_v17 = vand.u32 65535, %v1421_v43  ;;  %v1426_v1 = vshrl.u32 %v1421_v43, 16  ;;  %v1200_v56 = vmul.f32 -0.00019511016, %v3014_v40  ;;  %v1447_v26 = vand.u32 65535, %v1417_v59 }
 0x198   : > { %v1448_v51 = vshrl.u32 %v1417_v59, 16  ;;  %v878_v22 = vsub.s32 4, %v2539_v39  ;;  %v3038_v38 = vadd.f32 0.041655596, %v883_v62  ;;  %v3040_v20 = vadd.f32 -0.16666654, %v892_v61 }
 0x199   : > { %v1428_v36 = vmul.u32 %v1426_v1, %v1423_v5  ;;  %v1429_v12 = vmul.u32 %v1425_v17, %v1424_v29  ;;  %v1038_v48 = vmul.f32 -0.001358992, %v2988_v50  ;;  %v1046_v7 = vadd.f32 0.008332121, %v1045_v45 }
 0x19a   : > { %v1450_v6 = vmul.u32 %v1448_v51, %v1423_v5  ;;  %v1313_v33 = vadd.s32 %v2863_v16, %v2858_v24  ;;  %v1334_v55 = vadd.s32 127, %v1333_v52  ;;  %v1427_v57 = vmul.u32 %v1425_v17, %v1423_v5 }
 0x19b   : > { %v1431_v41 = vshll.u32 %v1428_v36, 16  ;;  %v1201_v47 = vadd.f32 0.008332121, %v1200_v56  ;;  %v1449_v31 = vmul.u32 %v1447_v26, %v1423_v5  ;;  %v1451_v59 = vmul.u32 %v1447_v26, %v1424_v29 }
 0x19c   : > { %v1453_v43 = vshll.u32 %v1450_v6, 16  ;;  %v1430_v62 = vmul.u32 %v1426_v1, %v1424_v29  ;;  %v1433_v30 = vshll.u32 %v1429_v12, 16  ;;  %v1329_v61 = vsub.s32 32, %v3016_v46 }
 0x19d   : > { %vm1435_vm14 = vc.u32 %v1427_v57, %v1431_v41  ;;  %v1437_v37 = vadd.s32 %v1431_v41, %v1427_v57  ;;  %v1452_v45 = vmul.u32 %v1448_v51, %v1424_v29  ;;  %v1335_v53 = vshll.u32 %v1334_v55, 23 }
 0x19e   : > { %v1436_v49 = vsel %vm1435_vm14, 1, %v3313_v58  ;;  %vm1457_vm15 = vc.u32 %v1449_v31, %v1453_v43  ;;  %v1455_v5 = vshll.u32 %v1451_v59, 16  ;;  %v1459_v52 = vadd.s32 %v1453_v43, %v1449_v31 }
 0x19f   : > { %v1438_v19 = vadd.s32 %v1436_v49, %v1430_v62  ;;  %vm1439_vm0 = vc.u32 %v1437_v37, %v1433_v30  ;;  %v1458_v24 = vsel %vm1457_vm15, 1, %v3313_v58  ;;  %v1047_v1 = vmul.f32 %v1046_v7, %v2988_v50 }
 0x1a0   : > { %v1440_v16 = vsel %vm1439_vm0, 1, %v3313_v58  ;;  %v1460_v17 = vadd.s32 %v1458_v24, %v1452_v45  ;;  %v1193_v56 = vmul.f32 -0.001358992, %v3014_v40  ;;  %v1432_v26 = vshrl.u32 %v1428_v36, 16 }
 0x1a1   : > { %v1442_v57 = vadd.s32 %v1440_v16, %v1438_v19  ;;  %v1331_v41 = vshrl.u32 %v1313_v33, %v1329_v61  ;;  %v1390_v29 = vshrl.u32 %v3314_v2, %v2916_v44  ;;  %v1411_v49 = vsel %vm1409_vm8, %v2970_v0, 2102212464 }
 0x1a2   : > { %vm1461_vm1 = vc.u32 %v1459_v52, %v1455_v5  ;;  %v1202_v30 = vmul.f32 %v1201_v47, %v3014_v40  ;;  %v1434_v37 = vshrl.u32 %v1429_v12, 16  ;;  %v1330_v7 = vshll.u32 %v2937_v27, %v3016_v46  ;;  %v3329_v27 = vld [vmem:[#allocation10_spill] sm:$0xff] }
 0x1a3   : > { %v1443_v51 = vadd.s32 %v1442_v57, %v1432_v26  ;;  %v1462_v55 = vsel %vm1461_vm1, 1, %v3313_v58  ;;  %v1336_v36 = vor.u32 4788187, %v1335_v53  ;;  %v1454_v19 = vshrl.u32 %v1450_v6, 16 }
 0x1a4   : > { %v1464_v33 = vadd.s32 %v1462_v55, %v1460_v17  ;;  %v1194_v31 = vadd.f32 0.041655596, %v1193_v56  ;;  %v1410_v2 = vsel %vm1406_vm6, %v1390_v29, %v2966_v11  ;;  %v1412_v44 = vsel %vm1408_vm10, %v2968_v3, %v1411_v49  ;;  %v3330_v11 = vld [vmem:[#allocation12_spill] sm:$0xff] }
 0x1a5   : > { %v3066_v0 = vadd.s32 %v1443_v51, %v1434_v37  ;;  %v1039_v12 = vadd.f32 0.041655596, %v1038_v48  ;;  %v1332_v47 = vor.u32 %v1331_v41, %v1330_v7  ;;  %v1456_v58 = vshrl.u32 %v1451_v59, 16 }
 0x1a6   : > { %v1465_v43 = vadd.s32 %v1464_v33, %v1454_v19  ;;  %v879_v53 = vsel %vm756_vm9, %v878_v22, %v2539_v39  ;;  %v1033_v46 = vsub.s32 4, %v3329_v27  ;;  %v1203_v6 = vadd.f32 -0.16666654, %v1202_v30 }
 0x1a7   : > { %v3072_v62 = vadd.s32 %v1459_v52, %v1455_v5  ;;  %v1188_v61 = vsub.s32 4, %v3330_v11  ;;  %v1337_v45 = vand.u32 2147483647, %v1336_v36  ;;  %v1413_v3 = vsel %vm1407_vm13, %v1410_v2, %v1412_v44  ;;  %v3331_v52 = vld [vmem:[#allocation11_spill] sm:$0xff] }
 0x1a8   : > { %v1466_v24 = vadd.s32 %v1465_v43, %v1456_v58  ;;  %vm591_vm3 = vcmp.eq.s32.totalorder %v2614_v8, 0  ;;  %v885_v48 = vmul.f32 %v3038_v38, %v2907_v28  ;;  %v1048_v59 = vadd.f32 -0.16666654, %v1047_v1 }
 0x1a9   : > { %v1195_v39 = vmul.f32 %v1194_v31, %v3014_v40  ;;  %vm1469_vm9 = vc.u32 %v3066_v0, %v3072_v62  ;;  %v894_v22 = vmul.f32 %v3040_v20, %v2907_v28  ;;  %v1040_v16 = vmul.f32 %v1039_v12, %v2988_v50 }
 0x1aa   : > { %v1339_v5 = vcvt.s32.f32 %v1332_v47  ;;  %v1470_v14 = vadd.s32 1, %v1466_v24  ;;  %v741_v17 = vmul.f32 %v3034_v4, %v3331_v52  ;;  %v881_v56 = vsel %vm2848_vm12, 0, %v879_v53 }
 0x1ab   : > { %v1204_v38 = vmul.f32 %v1203_v6, %v3014_v40  ;;  %v1467_v1 = vmul.u32 %v2997_v63, %v1413_v3  ;;  %v1034_v26 = vsel %vm911_vm11, %v1033_v46, %v3329_v27  ;;  %v1189_v20 = vsel %vm1066_vm7, %v1188_v61, %v3330_v11  ;;  %v3333_v46 = vld [vmem:[#allocation8_spill] sm:$0xff] }
 0x1ac   : > { %v1340_v57 = vmul.f32 %v1339_v5, %v1337_v45  ;;  %v1471_v41 = vsel %vm1469_vm9, %v1470_v14, %v1466_v24  ;;  %v886_v29 = vadd.f32 -0.4999988, %v885_v48  ;;  %v1049_v4 = vmul.f32 %v1048_v59, %v2988_v50 }
 0x1ad   : > { %v1196_v49 = vadd.f32 -0.4999988, %v1195_v39  ;;  %v1472_v32 = vadd.s32 %v1471_v41, %v1467_v1  ;;  %vm746_vm12 = vcmp.eq.s32.totalorder %v2930_v60, 0  ;;  %vm749_vm5 = vcmp.eq.s32.totalorder %v2930_v60, 2  ;;  %v3338_v1 = vld [vmem:[#allocation5_spill] sm:$0xff] }
 0x1ae   : > { %v895_v63 = vadd.f32 1.0, %v894_v22  ;;  %v1041_v30 = vadd.f32 -0.4999988, %v1040_v16  ;;  %vm590_vm6 = vcmp.lt.s32.totalorder %v2614_v8, 2  ;;  %vm745_vm11 = vcmp.lt.s32.totalorder %v2930_v60, 2  ;;  %v3337_v22 = vld [vmem:[#allocation6_spill] sm:$0xff] }
 0x1af   : > { %v750_v37 = vxor.u32 2147483648, %v2984_v21  ;;  %v1191_v51 = vsel %vm2980_vm4, 0, %v1189_v20  ;;  %v1205_v55 = vadd.f32 1.0, %v1204_v38  ;;  %v1473_v7 = vadd.s32 536870912, %v1472_v32 }
 0x1b0   : > { %v747_v36 = vxor.u32 2147483648, %v741_v17  ;;  %v898_v19 = vadd.s32 3, %v881_v56  ;;  %v1036_v33 = vsel %vm2922_vm2, 0, %v1034_v26  ;;  %v1341_v31 = vxor.u32 2147483648, %v1340_v57  ;;  %v3339_v26 = vld [vmem:[#allocation7_spill] sm:$0xff] }
 0x1b1   : > { %v887_v2 = vmul.f32 %v886_v29, %v2907_v28  ;;  %v1050_v44 = vadd.f32 1.0, %v1049_v4  ;;  %v1197_v12 = vmul.f32 %v1196_v49, %v3014_v40  ;;  %v3110_v47 = vshrl.u32 %v1473_v7, 30 }
 0x1b2   : > { %v3332_v58 = vxor.u32 2147483648, %v2896_v23  ;;  %v896_v43 = vmul.f32 %v895_v63, %v2893_v18  ;;  %v1042_v53 = vmul.f32 %v1041_v30, %v2988_v50  ;;  %v1208_v25 = vadd.s32 3, %v1191_v51 }
 0x1b3   : > { %v751_v27 = vsel %vm749_vm5, %v750_v37, %v741_v17  ;;  %v1206_v28 = vmul.f32 %v1205_v55, %v2993_v9  ;;  %vm1221_vm2 = vcmp.lt.s32.totalorder %v3333_v46, 0  ;;  %v1475_v40 = vshll.u32 %v3110_v47, 30 }
 0x1b4   : > { %v593_v10 = vsel %vm591_vm3, %v2888_v34, %v3332_v58  ;;  %v748_v23 = vsel %vm746_vm12, %v2984_v21, %v747_v36  ;;  %v899_v6 = vand.u32 3, %v898_v19  ;;  %v1053_v34 = vadd.s32 3, %v1036_v33 }
 0x1b5   : > { %v1342_v18 = vsel %vm1221_vm2, %v1341_v31, %v1340_v57  ;;  %v888_v50 = vadd.f32 1.0, %v887_v2  ;;  %v1051_v11 = vmul.f32 %v1050_v44, %v2942_v42  ;;  %v1198_v61 = vadd.f32 1.0, %v1197_v12 }
 0x1b6   : > { %v3130_v45 = vsub.s32 %v1472_v32, %v1475_v40  ;;  %v902_v9 = vxor.u32 2147483648, %v896_v43  ;;  %v1043_v3 = vadd.f32 1.0, %v1042_v53  ;;  %v1209_v24 = vand.u32 3, %v1208_v25 }
 0x1b7   : > { %v3334_v48 = vand.u32 2147483647, %v3333_v46  ;;  %v1212_v21 = vxor.u32 2147483648, %v1206_v28  ;;  %vm587_vm8 = vweird.f32 %v3337_v22  ;;  %v597_v16 = vsel %vm590_vm6, %v593_v10, %v2975_v35  ;;  %v3340_v10 = vld [vmem:[#allocation14_spill] sm:$0xff] }
 0x1b8   : > { %vm1477_vm4 = vcmp.lt.s32.totalorder %v3130_v45, 0  ;;  %v1478_v42 = vsub.s32 0, %v3130_v45  ;;  %v752_v5 = vsel %vm745_vm11, %v748_v23, %v751_v27  ;;  %vm897_vm10 = vweird.f32 %v2237_v15 }
 0x1b9   : > { %vm3134_vm7 = vcmp.le.f32.partialorder %v3334_v48, 0.7853982  ;;  %vm900_vm13 = vcmp.lt.s32.totalorder %v899_v6, 2  ;;  %v1054_v14 = vand.u32 3, %v1053_v34  ;;  %v905_v52 = vxor.u32 2147483648, %v888_v50 }
 0x1ba   : > { %v3141_v39 = vsel %vm3134_vm7, %v3333_v46, %v1342_v18  ;;  %v1057_v17 = vxor.u32 2147483648, %v1051_v11  ;;  %v1215_v56 = vxor.u32 2147483648, %v1198_v61  ;;  %v1479_v38 = vsel %vm1477_vm4, %v1478_v42, %v3130_v45 }
 0x1bb   : > { %vm432_vm14 = vweird.f32 %v3338_v1  ;;  %vm742_vm15 = vweird.f32 %v3339_v26  ;;  %vm901_vm0 = vcmp.eq.s32.totalorder %v899_v6, 0  ;;  %vm1211_vm1 = vcmp.eq.s32.totalorder %v1209_v24, 0 }
 0x1bc   : > { %v3157_v8 = vmul.f32 %v3141_v39, %v3141_v39  ;;  %v1480_v60 = vclz %v1479_v38  ;;  %v903_v35 = vsel %vm901_vm0, %v888_v50, %v902_v9  ;;  %vm904_vm3 = vcmp.eq.s32.totalorder %v899_v6, 2 }
 0x1bd   : > { %v1060_v20 = vxor.u32 2147483648, %v1043_v3  ;;  %v1213_v57 = vsel %vm1211_vm1, %v1198_v61, %v1212_v21  ;;  %vm1056_vm9 = vcmp.eq.s32.totalorder %v1054_v14, 0  ;;  %vm1059_vm12 = vcmp.eq.s32.totalorder %v1054_v14, 2  ;;  %v3341_v61 = vld [vmem:[#allocation13_spill] sm:$0xff] }
 0x1be   : > { %vm1214_vm5 = vcmp.eq.s32.totalorder %v1209_v24, 2  ;;  %v1697_v41 = vadd.s32 4294967294, %v1480_v60  ;;  %v906_v29 = vsel %vm904_vm3, %v905_v52, %v896_v43  ;;  %v1058_v4 = vsel %vm1056_vm9, %v1043_v3, %v1057_v17 }
 0x1bf   : > { %vm1210_vm6 = vcmp.lt.s32.totalorder %v1209_v24, 2  ;;  %v1216_v49 = vsel %vm1214_vm5, %v1215_v56, %v1206_v28  ;;  %v907_v32 = vsel %vm900_vm13, %v903_v35, %v906_v29  ;;  %v1355_v30 = vmul.f32 -0.00019511016, %v3157_v8  ;;  %v3342_v24 = vld [vmem:[#allocation9_spill] sm:$0xff] }
 0x1c0   : > { %v1217_v63 = vsel %vm1210_vm6, %v1213_v57, %v1216_v49  ;;  %vm1698_vm11 = vcmp.lt.s32.totalorder %v1697_v41, 0  ;;  %vm1055_vm4 = vcmp.lt.s32.totalorder %v1054_v14, 2  ;;  %v1061_v37 = vsel %vm1059_vm12, %v1060_v20, %v1051_v11 }
 0x1c1   : > { %vm1207_vm0 = vweird.f32 %v2523_v54  ;;  %v1483_v51 = vsel %vm1698_vm11, 0, %v1697_v41  ;;  %v1062_v55 = vsel %vm1055_vm4, %v1058_v4, %v1061_v37  ;;  %v1468_v7 = vadd.s32 %v3072_v62, %v3066_v0 }
 0x1c2   : > { %v1484_v36 = vsub.s32 32, %v1483_v51  ;;  %v1488_v19 = vsub.s32 4294967266, %v1483_v51  ;;  %v598_v33 = vsel %vm587_vm8, nan, %v597_v16  ;;  %v908_v31 = vsel %vm897_vm10, nan, %v907_v32 }
 0x1c3   : > { %vm1052_vm13 = vweird.f32 %v2259_v13  ;;  %v1218_v2 = vsel %vm1207_vm0, nan, %v1217_v63  ;;  %v1356_v44 = vadd.f32 0.008332121, %v1355_v30  ;;  %v1485_v54 = vshll.u32 %v3130_v45, %v1483_v51 }
 0x1c4   : > { %v1486_v12 = vshrl.u32 %v1468_v7, %v1484_v36  ;;  %v1489_v58 = vadd.s32 127, %v1488_v19  ;;  %v443_v0 = vsel %vm432_vm14, nan, %v3340_v10  ;;  %v753_v62 = vsel %vm742_vm15, nan, %v752_v5 }
 0x1c5   : > { %v1063_v43 = vsel %vm1052_vm13, nan, %v1062_v55  ;;  %v1348_v53 = vmul.f32 -0.001358992, %v3157_v8  ;;  %v1708_v27 = vpack.c.bf16 %v598_v33, %v443_v0  ;;  %v1713_v13 = vpack.c.bf16 %v908_v31, %v753_v62 }
 0x1c6   : > { %v1487_v15 = vor.u32 %v1486_v12, %v1485_v54  ;;  %v1490_v25 = vshll.u32 %v1489_v58, 23  ;;  %v1718_v28 = vpack.c.bf16 %v1218_v2, %v1063_v43  ;;  %v1357_v40 = vmul.f32 %v1356_v44, %v3157_v8 }
 0x1c7   : > { %1709 = vst [vmem:[%s3180_s18] sm:$0xff] %v1708_v27   ;;  %v1349_v6 = vadd.f32 0.041655596, %v1348_v53  ;;  %v1343_v45 = vsub.s32 4, %v3341_v61  ;;  %vm1376_vm8 = vcmp.lt.s32.totalorder %v3342_v24, 0  ;;  %v3343_v21 = vand.u32 2147483647, %v3342_v24 }
 0x1c8   : > { %v1491_v23 = vor.u32 4788187, %v1490_v25  ;;  %1725 = vst [vmem:[%s3180_s18 + $0x8] sm:$0xff] %v1713_v13   ;;  %v1494_v18 = vcvt.s32.f32 %v1487_v15  ;;  %v1358_v50 = vadd.f32 -0.16666654, %v1357_v40  ;;  %v1498_v5 = vsub.s32 4, %v3110_v47 }
 0x1c9   : > { %1726 = vst [vmem:[%s3180_s18 + $0x10] sm:$0xff] %v1718_v28   ;;  %v1350_v9 = vmul.f32 %v1349_v6, %v3157_v8  ;;  %vm3191_vm10 = vcmp.le.f32.partialorder %v3343_v21, 0.7853982  ;;  %v1344_v16 = vsel %vm1221_vm2, %v1343_v45, %v3341_v61  ;;  %vm1362_vm9 = vweird.f32 %v3333_v46 }
 0x1ca   : > { %v1492_v34 = vand.u32 2147483647, %v1491_v23  ;;  %v1359_v48 = vmul.f32 %v1358_v50, %v3157_v8  ;;  %v1346_v56 = vsel %vm3134_vm7, 0, %v1344_v16  ;;  %v1499_v60 = vsel %vm1376_vm8, %v1498_v5, %v3110_v47 }
 0x1cb   : > { %v1351_v52 = vadd.f32 -0.4999988, %v1350_v9  ;;  %v1363_v41 = vadd.s32 3, %v1346_v56  ;;  %v1501_v4 = vsel %vm3191_vm10, 0, %v1499_v60  ;;  %vm1517_vm12 = vweird.f32 %v3342_v24 }
 0x1cc   : > { %v1495_v11 = vmul.f32 %v1494_v18, %v1492_v34  ;;  %v1360_v38 = vadd.f32 1.0, %v1359_v48  ;;  %v1518_v51 = vadd.s32 3, %v1501_v4 }
 0x1cd   : > { %v1352_v35 = vmul.f32 %v1351_v52, %v3157_v8  ;;  %v1364_v37 = vand.u32 3, %v1363_v41 }
 0x1ce   : > { %v1496_v3 = vxor.u32 2147483648, %v1495_v11  ;;  %v1361_v29 = vmul.f32 %v1360_v38, %v3141_v39  ;;  %v1519_v39 = vand.u32 3, %v1518_v51 }
 0x1cf   : > { %v1353_v59 = vadd.f32 1.0, %v1352_v35  ;;  %vm1366_vm2 = vcmp.eq.s32.totalorder %v1364_v37, 0  ;;  %vm1369_vm7 = vcmp.eq.s32.totalorder %v1364_v37, 2  ;;  %vm1365_vm14 = vcmp.lt.s32.totalorder %v1364_v37, 2 }
 0x1d0   : > { %v1497_v22 = vsel %vm1376_vm8, %v1496_v3, %v1495_v11  ;;  %v1367_v55 = vxor.u32 2147483648, %v1361_v29  ;;  %vm1521_vm15 = vcmp.eq.s32.totalorder %v1519_v39, 0  ;;  %vm1524_vm1 = vcmp.eq.s32.totalorder %v1519_v39, 2 }
 0x1d1   : > { %v1500_v14 = vsel %vm3191_vm10, %v3342_v24, %v1497_v22  ;;  %v1370_v8 = vxor.u32 2147483648, %v1353_v59  ;;  %vm1520_vm3 = vcmp.lt.s32.totalorder %v1519_v39, 2 }
 0x1d2   : > { %v1502_v17 = vmul.f32 %v1500_v14, %v1500_v14  ;;  %v1368_v33 = vsel %vm1366_vm2, %v1353_v59, %v1367_v55 }
 0x1d3   : > { %v1371_v44 = vsel %vm1369_vm7, %v1370_v8, %v1361_v29 }
 0x1d4   : > { %v1503_v1 = vmul.f32 -0.001358992, %v1502_v17  ;;  %v1510_v26 = vmul.f32 -0.00019511016, %v1502_v17  ;;  %v1372_v12 = vsel %vm1365_vm14, %v1368_v33, %v1371_v44 }
 0x1d5   : > { %v1373_v62 = vsel %vm1362_vm9, nan, %v1372_v12 }
 0x1d6   : > { %v1504_v20 = vadd.f32 0.041655596, %v1503_v1  ;;  %v1511_v57 = vadd.f32 0.008332121, %v1510_v26 }
 0x1d8   : > { %v1505_v49 = vmul.f32 %v1504_v20, %v1502_v17  ;;  %v1512_v32 = vmul.f32 %v1511_v57, %v1502_v17 }
 0x1da   : > { %v1506_v63 = vadd.f32 -0.4999988, %v1505_v49  ;;  %v1513_v30 = vadd.f32 -0.16666654, %v1512_v32 }
 0x1dc   : > { %v1507_v47 = vmul.f32 %v1506_v63, %v1502_v17  ;;  %v1514_v7 = vmul.f32 %v1513_v30, %v1502_v17 }
 0x1de   : > { %v1508_v36 = vadd.f32 1.0, %v1507_v47  ;;  %v1515_v19 = vadd.f32 1.0, %v1514_v7 }
 0x1e0   : > { %v1516_v31 = vmul.f32 %v1515_v19, %v1500_v14  ;;  %v1525_v2 = vxor.u32 2147483648, %v1508_v36 }
 0x1e2   : > { %v1522_v54 = vxor.u32 2147483648, %v1516_v31  ;;  %v1526_v10 = vsel %vm1524_vm1, %v1525_v2, %v1516_v31 }
 0x1e4   : > { %v1523_v58 = vsel %vm1521_vm15, %v1508_v36, %v1522_v54 }
 0x1e5   : > { %v1527_v0 = vsel %vm1520_vm3, %v1523_v58, %v1526_v10 }
 0x1e6   : > { %v1528_v43 = vsel %vm1517_vm12, nan, %v1527_v0 }
 0x1e7   : > { %v1723_v53 = vpack.c.bf16 %v1528_v43, %v1373_v62 }
 0x1e9   : > { %1727 = vst [vmem:[%s3180_s18 + $0x18] sm:$0xff] %v1723_v53  }
 0x1ea   : > { %1824 = shalt.err (!%p1821_p5)
}
 0x1eb   : > { %s1884_s9 = smov 64   ;;  %s1885_s10 = smov 4  }
 0x1ec   : > { %1731 = dma.vmem_to_hbm [thread:$0]  (%p1946_p4), %s1560_s15, 512, %s1562_s27, %s1546_s28, %s1884_s9, %s1884_s9, %s1885_s10  }
 0x1ed PF: > { %p1737_p6 = scmp.ge.s32.totalorder %s1875_s17, 2  ;;  %s1576_s11 = sand.u32 1, %s1855_s12  }
 0x1ee   : > { %s1577_s18 = scalar_lea.sflag [#allocation3], %s1576_s11 }
 0x1ef   : > { %p1734_p7 = pnand %p1737_p6, %p1953_p8 }
 0x1f1   : > { %p1735_p9 = pneg %p1734_p7 }
 0x1f3   : > { %1850 = dma.done.wait (%p1735_p9), %s1577_s18, 512  }
 0x1f4   : > { %1852 = vsyncadd (%p1735_p9), %s1577_s18, 4294966784  ;;  %s16_s17 = sadd.s32 1, %s1875_s17   ;;  %s3346_s12 = smov %s1859_s13 }
 0x1f5   : > { %p13_p10 = scmp.ge.s32.totalorder %s16_s17, 4   ;;  %s3347_s13 = smov %s1863_s14 }
 0x1f6   : > { %s3348_s14 = smov %s1959_s25  ;;  %s3349_s15 = smov %s1871_s16 }
 0x1f7   : > { %s3350_s16 = smov %s3352_s20  ;;  %15 = sbr.rel (!%p13_p10) target bundleno = 4 (0x4), region = 73 }
 0x1fc   :  { %1583 = vsyncpa [#allocation3], 1 }
 0x1fd   :  { %1585 = vsyncpa [#allocation3 + $0x1], 1 }

</bundles_post_ra>
